<compile_context>
chip_gen: v5e
topology: v5e:2x2
jax: 0.10.0
libtpu: 0.0.40
codegen_flags: <defaults>
</compile_context>

<pallas_src>
import jax
import jax.numpy as jnp
from jax.experimental import pallas as pl
from jax.experimental.pallas import tpu as pltpu

LANE = 128


def _round_up(n, m):
    return ((n + m - 1) // m) * m


def _pick_batch_tile(B):
    """Batch tile / padded batch selection (all values static at trace time).

    - tiles are multiples of 16 (bf16 native (16,128) tile),
    - 16 < B <= 512 -> two balanced grid steps (keeps both v7x TCs busy),
    - B  > 512      -> 256-row tiles (v6e/v7x overhead amortization, still a
                       multiple of 128 for v5e's MXU).
    """
    if B <= 16:
        tb = _round_up(max(B, 1), 16)
        return tb, tb
    if B <= 512:
        tb = _round_up((B + 1) // 2, 16)
    else:
        tb = 256
    return tb, _round_up(B, tb)


def _mlp_kernel(x_ref, w1_ref, b1_ref, w2_ref, b2_ref, w3_ref, b3_ref,
                o_ref, xb_ref, h1_ref, h2_ref):
    """One batch tile, whole model.

    x_ref : (TB, D)       f32  (cast to bf16 in-kernel)
    w1_ref: (D, H_pad)    bf16   b1_ref: (1, H_pad) f32
    w2_ref: (H_pad, H_pad)bf16   b2_ref: (1, H_pad) f32
    w3_ref: (H_pad, C_pad)bf16   b3_ref: (1, C_pad) f32
    o_ref : (TB, C_pad)   bf16
    xb_ref: (TB, D)       bf16 VMEM scratch (fused input cast)
    h1_ref, h2_ref: (TB, H_pad) bf16 VMEM scratch
    """
    # fused f32 -> bf16 input cast; stays in VMEM, no extra HBM round trip
    xb_ref[...] = x_ref[...].astype(xb_ref.dtype)

    # layer 1: bf16 matmul, f32 accumulate, f32 bias + ReLU, bf16 store
    h1 = jnp.dot(xb_ref[...], w1_ref[...], preferred_element_type=jnp.float32)
    h1 = jnp.maximum(h1 + b1_ref[...], 0.0)
    h1_ref[...] = h1.astype(h1_ref.dtype)

    # layer 2
    h2 = jnp.dot(h1_ref[...], w2_ref[...], preferred_element_type=jnp.float32)
    h2 = jnp.maximum(h2 + b2_ref[...], 0.0)
    h2_ref[...] = h2.astype(h2_ref.dtype)

    # output head (the selected head's padded weights are passed in)
    o_ref[...] = (jnp.dot(h2_ref[...], w3_ref[...],
                          preferred_element_type=jnp.float32)
                  + b3_ref[...]).astype(o_ref.dtype)


@jax.jit
def mlp_forward_padded(x_flat, w1, b1, w2, b2, w3, b3):
    """Runs the fused MLP on a (B, D) f32 input.

    Weights are pre-padded bf16 in (in, out) layout (K of layer 1 stays at the
    true D).  Returns padded bf16 logits (B_pad, C_pad); caller slices back to
    (B, classes) and casts to f32.
    """
    B, D = x_flat.shape
    H_pad = w1.shape[1]
    C_pad = w3.shape[1]

    tile_b, B_pad = _pick_batch_tile(B)
    grid = (B_pad // tile_b,)

    # only pad the batch dim (cheap, and a no-op when B is already aligned);
    # padded rows produce bias-only logits and are sliced off by the caller.
    x_in = x_flat
    if B_pad != B:
        x_in = jnp.pad(x_flat, ((0, B_pad - B), (0, 0)))

    flops = 2 * B_pad * (D * H_pad + H_pad * H_pad + H_pad * C_pad)
    bytes_accessed = (
        x_in.size * x_in.dtype.itemsize
        + w1.size * w1.dtype.itemsize + b1.size * b1.dtype.itemsize
        + w2.size * w2.dtype.itemsize + b2.size * b2.dtype.itemsize
        + w3.size * w3.dtype.itemsize + b3.size * b3.dtype.itemsize
        + B_pad * C_pad * 2)

    return pl.pallas_call(
        _mlp_kernel,
        out_shape=jax.ShapeDtypeStruct((B_pad, C_pad), jnp.bfloat16),
        grid=grid,
        in_specs=[
            pl.BlockSpec((tile_b, D), lambda i: (i, 0)),      # x tile moves
            pl.BlockSpec((D, H_pad), lambda i: (0, 0)),       # weights resident
            pl.BlockSpec((1, H_pad), lambda i: (0, 0)),
            pl.BlockSpec((H_pad, H_pad), lambda i: (0, 0)),
            pl.BlockSpec((1, H_pad), lambda i: (0, 0)),
            pl.BlockSpec((H_pad, C_pad), lambda i: (0, 0)),
            pl.BlockSpec((1, C_pad), lambda i: (0, 0)),
        ],
        out_specs=pl.BlockSpec((tile_b, C_pad), lambda i: (i, 0)),
        scratch_shapes=[
            pltpu.VMEM((tile_b, D), jnp.bfloat16),      # xb (fused cast)
            pltpu.VMEM((tile_b, H_pad), jnp.bfloat16),  # h1
            pltpu.VMEM((tile_b, H_pad), jnp.bfloat16),  # h2
        ],
        compiler_params=pltpu.CompilerParams(
            dimension_semantics=("parallel",)),
        cost_estimate=pl.CostEstimate(
            flops=flops, transcendentals=0, bytes_accessed=bytes_accessed),
    )(x_in, w1, b1, w2, b2, w3, b3)


def init_mlp_params(key, in_size=28, in_channels=1, fc_size=400, classes=10,
                    tasks=2):
    """PyTorch-Linear-style uniform init, stored (in_features, out_features), f32."""
    d_in = in_size * in_size * in_channels

    def linear(k, fan_in, fan_out):
        kw, kb = jax.random.split(k)
        bound = 1.0 / jnp.sqrt(fan_in)
        w = jax.random.uniform(kw, (fan_in, fan_out), jnp.float32, -bound, bound)
        b = jax.random.uniform(kb, (1, fan_out), jnp.float32, -bound, bound)
        return w, b

    keys = jax.random.split(key, 2 + tasks)
    w1, b1 = linear(keys[0], d_in, fc_size)
    w2, b2 = linear(keys[1], fc_size, fc_size)
    heads = [linear(keys[2 + t], fc_size, classes) for t in range(tasks)]
    return (w1, b1, w2, b2, heads)


def _pad_linear(w, b, in_pad, out_pad):
    """Zero-pad a (in, out) weight / (1, out) bias; w -> bf16, b stays f32."""
    fan_in, fan_out = w.shape
    wp = jnp.zeros((in_pad, out_pad), jnp.float32).at[:fan_in, :fan_out].set(w)
    bp = jnp.zeros((1, out_pad), jnp.float32).at[:, :fan_out].set(b)
    return wp.astype(jnp.bfloat16), bp


class MLPPallas:
    """Thin wrapper mirroring the PyTorch MLP (multihead=True, scenario='task')."""

    def __init__(self, in_size=28, in_channels=1, fc_size=400, classes=10,
                 tasks=2, key=jax.random.PRNGKey(0)):
        self.in_size = in_size
        self.in_channels = in_channels
        self.tasks = tasks
        self.classes_per_task = classes
        self.task_nr = 0

        self.d_in = in_size * in_size * in_channels   # K of layer 1 (un-padded)
        self.h_pad = _round_up(fc_size, LANE)         # 400 -> 512
        self.c_pad = _round_up(classes, LANE)         # 10  -> 128

        # un-padded f32 params (reference / checkpoint layout)
        (self.w1, self.b1, self.w2, self.b2, self.heads) = init_mlp_params(
            key, in_size, in_channels, fc_size, classes, tasks)

        # padded bf16 kernel params (layer-1 input dim stays at d_in)
        self.w1_p, self.b1_p = _pad_linear(self.w1, self.b1, self.d_in, self.h_pad)
        self.w2_p, self.b2_p = _pad_linear(self.w2, self.b2, self.h_pad, self.h_pad)
        self.heads_p = [_pad_linear(w, b, self.h_pad, self.c_pad)
                        for (w, b) in self.heads]

    def forward(self, x_nchw):
        # glue: flatten NCHW -> (B, C*H*W), same order as torch.nn.Flatten
        B = x_nchw.shape[0]
        x_flat = x_nchw.reshape(B, -1)
        w3p, b3p = self.heads_p[self.task_nr]   # multihead selection (static)
        logits_pad = mlp_forward_padded(
            x_flat, self.w1_p, self.b1_p, self.w2_p, self.b2_p, w3p, b3p)
        return logits_pad[:B, :self.classes_per_task].astype(jnp.float32)

    # TODO(synk): train_batch/train_epoch/test_epoch are host-side training
    # loops (optimizer, dataloaders) and are intentionally not ported here.


if __name__ == "__main__":
    key = jax.random.PRNGKey(0)
    k_param, k_data = jax.random.split(key)

    model = MLPPallas(in_size=28, in_channels=1, fc_size=400, classes=10,
                      tasks=2, key=k_param)

    def reference(x_nchw, task):
        """Plain-JAX reference on the same bf16-in / f32-acc / bf16-out path."""
        xb = x_nchw.reshape(x_nchw.shape[0], -1).astype(jnp.bfloat16)
        w3, b3 = model.heads[task]
        h1 = jnp.maximum(
            jnp.dot(xb, model.w1.astype(jnp.bfloat16),
                    preferred_element_type=jnp.float32) + model.b1, 0.0
        ).astype(jnp.bfloat16)
        h2 = jnp.maximum(
            jnp.dot(h1, model.w2.astype(jnp.bfloat16),
                    preferred_element_type=jnp.float32) + model.b2, 0.0
        ).astype(jnp.bfloat16)
        out = jnp.dot(h2, w3.astype(jnp.bfloat16),
                      preferred_element_type=jnp.float32) + b3
        return out.astype(jnp.bfloat16).astype(jnp.float32)

    # small batch (single grid step), head 0
    B = 2
    x = jax.random.normal(k_data, (B, 1, 28, 28), dtype=jnp.float32)
    model.task_nr = 0
    logits = jax.block_until_ready(model.forward(x))
    assert logits.shape == (B, 10), logits.shape
    ref = reference(x, 0)
    assert jnp.allclose(logits, ref, atol=1e-2, rtol=1e-2), (
        float(jnp.max(jnp.abs(logits - ref))))

    # larger ragged batch (2 grid steps, batch padding exercised), head 1
    B2 = 40
    x2 = jax.random.normal(jax.random.PRNGKey(1), (B2, 1, 28, 28),
                           dtype=jnp.float32)
    model.task_nr = 1
    logits2 = jax.block_until_ready(model.forward(x2))
    assert logits2.shape == (B2, 10), logits2.shape
    ref2 = reference(x2, 1)
    assert jnp.allclose(logits2, ref2, atol=1e-2, rtol=1e-2), (
        float(jnp.max(jnp.abs(logits2 - ref2))))

    print("KERNEL_OK")
</pallas_src>

<mosaic_0001>
module attributes {stable_mosaic.version = 11 : i64} {
  func.func @_mlp_kernel(%arg0: i32, %arg1: memref<16x784xf32, #tpu.memory_space<vmem>>, %arg2: memref<784x512xbf16, #tpu.memory_space<vmem>>, %arg3: memref<1x512xf32, #tpu.memory_space<vmem>>, %arg4: memref<512x512xbf16, #tpu.memory_space<vmem>>, %arg5: memref<1x512xf32, #tpu.memory_space<vmem>>, %arg6: memref<512x128xbf16, #tpu.memory_space<vmem>>, %arg7: memref<1x128xf32, #tpu.memory_space<vmem>>, %arg8: memref<16x128xbf16, #tpu.memory_space<vmem>>, %arg9: memref<16x784xbf16, #tpu.memory_space<vmem>>, %arg10: memref<16x512xbf16, #tpu.memory_space<vmem>>, %arg11: memref<16x512xbf16, #tpu.memory_space<vmem>>) attributes {dimension_semantics = [#tpu.dimension_semantics<parallel>], iteration_bounds = array<i64: 1>, scalar_prefetch = 0 : i64, scratch_operands = 3 : i64, tpu.core_type = #tpu.core_type<tc>, window_params = [{transform_indices = @transform_0, window_bounds = array<i64: 16, 784>}, {pipeline_mode = #tpu.pipeline_mode<synchronous>, transform_indices = @transform_1, window_bounds = array<i64: 784, 512>}, {pipeline_mode = #tpu.pipeline_mode<synchronous>, transform_indices = @transform_2, window_bounds = array<i64: 1, 512>}, {pipeline_mode = #tpu.pipeline_mode<synchronous>, transform_indices = @transform_3, window_bounds = array<i64: 512, 512>}, {pipeline_mode = #tpu.pipeline_mode<synchronous>, transform_indices = @transform_4, window_bounds = array<i64: 1, 512>}, {pipeline_mode = #tpu.pipeline_mode<synchronous>, transform_indices = @transform_5, window_bounds = array<i64: 512, 128>}, {pipeline_mode = #tpu.pipeline_mode<synchronous>, transform_indices = @transform_6, window_bounds = array<i64: 1, 128>}, {transform_indices = @transform_7, window_bounds = array<i64: 16, 128>}]} {
    %c0 = arith.constant 0 : index
    %c0_0 = arith.constant 0 : index
    %0 = vector.load %arg1[%c0, %c0_0] : memref<16x784xf32, #tpu.memory_space<vmem>>, vector<16x784xf32>
    %1 = arith.truncf %0 : vector<16x784xf32> to vector<16x784xbf16>
    %c0_1 = arith.constant 0 : index
    %c0_2 = arith.constant 0 : index
    %2 = vector.load %arg9[%c0_1, %c0_2] : memref<16x784xbf16, #tpu.memory_space<vmem>>, vector<16x784xbf16>
    tpu.vector_store %arg9[%c0_1, %c0_2], %1 {strides = array<i32>} : memref<16x784xbf16, #tpu.memory_space<vmem>>, vector<16x784xbf16>,
    %c0_3 = arith.constant 0 : index
    %c0_4 = arith.constant 0 : index
    %3 = vector.load %arg9[%c0_3, %c0_4] : memref<16x784xbf16, #tpu.memory_space<vmem>>, vector<16x784xbf16>
    %c0_5 = arith.constant 0 : index
    %c0_6 = arith.constant 0 : index
    %4 = vector.load %arg2[%c0_5, %c0_6] : memref<784x512xbf16, #tpu.memory_space<vmem>>, vector<784x512xbf16>
    %cst = arith.constant dense<0.000000e+00> : vector<16x512xf32>
    %5 = tpu.matmul %3, %4, %cst {dimension_numbers = #tpu.dot_dimension_numbers<[1], [0], [0], [1], [0, 0, 1, 1], [], []>} : vector<16x784xbf16>, vector<784x512xbf16>, vector<16x512xf32> -> vector<16x512xf32>
    %c0_7 = arith.constant 0 : index
    %c0_8 = arith.constant 0 : index
    %6 = vector.load %arg3[%c0_7, %c0_8] : memref<1x512xf32, #tpu.memory_space<vmem>>, vector<1x512xf32>
    %7 = vector.broadcast %6 : vector<1x512xf32> to vector<16x512xf32>
    %8 = arith.addf %5, %7 : vector<16x512xf32>
    %cst_9 = arith.constant 0.000000e+00 : f32
    %9 = vector.broadcast %cst_9 : f32 to vector<16x512xf32>
    %10 = arith.maximumf %8, %9 : vector<16x512xf32>
    %11 = arith.truncf %10 : vector<16x512xf32> to vector<16x512xbf16>
    %c0_10 = arith.constant 0 : index
    %c0_11 = arith.constant 0 : index
    %12 = vector.load %arg10[%c0_10, %c0_11] : memref<16x512xbf16, #tpu.memory_space<vmem>>, vector<16x512xbf16>
    tpu.vector_store %arg10[%c0_10, %c0_11], %11 {strides = array<i32>} : memref<16x512xbf16, #tpu.memory_space<vmem>>, vector<16x512xbf16>,
    %c0_12 = arith.constant 0 : index
    %c0_13 = arith.constant 0 : index
    %13 = vector.load %arg10[%c0_12, %c0_13] : memref<16x512xbf16, #tpu.memory_space<vmem>>, vector<16x512xbf16>
    %c0_14 = arith.constant 0 : index
    %c0_15 = arith.constant 0 : index
    %14 = vector.load %arg4[%c0_14, %c0_15] : memref<512x512xbf16, #tpu.memory_space<vmem>>, vector<512x512xbf16>
    %cst_16 = arith.constant dense<0.000000e+00> : vector<16x512xf32>
    %15 = tpu.matmul %13, %14, %cst_16 {dimension_numbers = #tpu.dot_dimension_numbers<[1], [0], [0], [1], [0, 0, 1, 1], [], []>} : vector<16x512xbf16>, vector<512x512xbf16>, vector<16x512xf32> -> vector<16x512xf32>
    %c0_17 = arith.constant 0 : index
    %c0_18 = arith.constant 0 : index
    %16 = vector.load %arg5[%c0_17, %c0_18] : memref<1x512xf32, #tpu.memory_space<vmem>>, vector<1x512xf32>
    %17 = vector.broadcast %16 : vector<1x512xf32> to vector<16x512xf32>
    %18 = arith.addf %15, %17 : vector<16x512xf32>
    %cst_19 = arith.constant 0.000000e+00 : f32
    %19 = vector.broadcast %cst_19 : f32 to vector<16x512xf32>
    %20 = arith.maximumf %18, %19 : vector<16x512xf32>
    %21 = arith.truncf %20 : vector<16x512xf32> to vector<16x512xbf16>
    %c0_20 = arith.constant 0 : index
    %c0_21 = arith.constant 0 : index
    %22 = vector.load %arg11[%c0_20, %c0_21] : memref<16x512xbf16, #tpu.memory_space<vmem>>, vector<16x512xbf16>
    tpu.vector_store %arg11[%c0_20, %c0_21], %21 {strides = array<i32>} : memref<16x512xbf16, #tpu.memory_space<vmem>>, vector<16x512xbf16>,
    %c0_22 = arith.constant 0 : index
    %c0_23 = arith.constant 0 : index
    %23 = vector.load %arg11[%c0_22, %c0_23] : memref<16x512xbf16, #tpu.memory_space<vmem>>, vector<16x512xbf16>
    %c0_24 = arith.constant 0 : index
    %c0_25 = arith.constant 0 : index
    %24 = vector.load %arg6[%c0_24, %c0_25] : memref<512x128xbf16, #tpu.memory_space<vmem>>, vector<512x128xbf16>
    %cst_26 = arith.constant dense<0.000000e+00> : vector<16x128xf32>
    %25 = tpu.matmul %23, %24, %cst_26 {dimension_numbers = #tpu.dot_dimension_numbers<[1], [0], [0], [1], [0, 0, 1, 1], [], []>} : vector<16x512xbf16>, vector<512x128xbf16>, vector<16x128xf32> -> vector<16x128xf32>
    %c0_27 = arith.constant 0 : index
    %c0_28 = arith.constant 0 : index
    %26 = vector.load %arg7[%c0_27, %c0_28] : memref<1x128xf32, #tpu.memory_space<vmem>>, vector<1x128xf32>
    %27 = vector.broadcast %26 : vector<1x128xf32> to vector<16x128xf32>
    %28 = arith.addf %25, %27 : vector<16x128xf32>
    %29 = arith.truncf %28 : vector<16x128xf32> to vector<16x128xbf16>
    %c0_29 = arith.constant 0 : index
    %c0_30 = arith.constant 0 : index
    %30 = vector.load %arg8[%c0_29, %c0_30] : memref<16x128xbf16, #tpu.memory_space<vmem>>, vector<16x128xbf16>
    tpu.vector_store %arg8[%c0_29, %c0_30], %29 {strides = array<i32>} : memref<16x128xbf16, #tpu.memory_space<vmem>>, vector<16x128xbf16>,
    return
  }
  func.func @transform_0(%arg0: i32) -> (i32, i32) {
    %c0_i32 = arith.constant 0 : i32
    %c0_i32_0 = arith.constant 0 : i32
    return %arg0, %c0_i32 : i32, i32
  }
  func.func @transform_1(%arg0: i32) -> (i32, i32) {
    %c0_i32 = arith.constant 0 : i32
    %c0_i32_0 = arith.constant 0 : i32
    %c0_i32_1 = arith.constant 0 : i32
    return %c0_i32, %c0_i32_0 : i32, i32
  }
  func.func @transform_2(%arg0: i32) -> (i32, i32) {
    %c0_i32 = arith.constant 0 : i32
    %c0_i32_0 = arith.constant 0 : i32
    %c0_i32_1 = arith.constant 0 : i32
    return %c0_i32, %c0_i32_0 : i32, i32
  }
  func.func @transform_3(%arg0: i32) -> (i32, i32) {
    %c0_i32 = arith.constant 0 : i32
    %c0_i32_0 = arith.constant 0 : i32
    %c0_i32_1 = arith.constant 0 : i32
    return %c0_i32, %c0_i32_0 : i32, i32
  }
  func.func @transform_4(%arg0: i32) -> (i32, i32) {
    %c0_i32 = arith.constant 0 : i32
    %c0_i32_0 = arith.constant 0 : i32
    %c0_i32_1 = arith.constant 0 : i32
    return %c0_i32, %c0_i32_0 : i32, i32
  }
  func.func @transform_5(%arg0: i32) -> (i32, i32) {
    %c0_i32 = arith.constant 0 : i32
    %c0_i32_0 = arith.constant 0 : i32
    %c0_i32_1 = arith.constant 0 : i32
    return %c0_i32, %c0_i32_0 : i32, i32
  }
  func.func @transform_6(%arg0: i32) -> (i32, i32) {
    %c0_i32 = arith.constant 0 : i32
    %c0_i32_0 = arith.constant 0 : i32
    %c0_i32_1 = arith.constant 0 : i32
    return %c0_i32, %c0_i32_0 : i32, i32
  }
  func.func @transform_7(%arg0: i32) -> (i32, i32) {
    %c0_i32 = arith.constant 0 : i32
    %c0_i32_0 = arith.constant 0 : i32
    return %arg0, %c0_i32 : i32, i32
  }
}

</mosaic_0001>

<bundles_post_ra>
// kernel: mlp_forward_padded.1
= control target key start
LH: loop header
LB: loop body
LE: loop exit
PB: predicated region body
PF: predicated region fallthrough
CT: control target
= control target key end

     0   :  { %12 = vsyncpa [#allocation6], 0  ;;  %s5424_s0 = inlined_call_operand.vmem [shape: f32[16,784], index: 0, kind: input, shape index: {}]   ;;  %s5425_s1 = inlined_call_operand.hbm [shape: bf16[784,512], index: 1, kind: input, shape index: {}]   ;;  %s5426_s2 = inlined_call_operand.vmem [shape: f32[1,512], index: 2, kind: input, shape index: {}]   ;;  %s5427_s3 = inlined_call_operand.hbm [shape: bf16[512,512], index: 3, kind: input, shape index: {}]   ;;  %s5428_s4 = inlined_call_operand.vmem [shape: f32[1,512], index: 4, kind: input, shape index: {}]   ;;  %s5429_s5 = inlined_call_operand.hbm [shape: bf16[512,128], index: 5, kind: input, shape index: {}]   ;;  %s5430_s6 = inlined_call_operand.vmem [shape: f32[1,128], index: 6, kind: input, shape index: {}]   ;;  %s5431_s7 = inlined_call_operand.hbm [shape: bf16[16,128], index: 7, kind: output, shape index: {}]  }
   0x1   :  { %13 = vsyncpa [#allocation9], 0 }
   0x2   :  { %14 = vsyncpa [#allocation7], 0  ;;  %s36_s26 = sshll.u32 %s5427_s3, 4  ;;  %s5128_s27 = smov [#allocation8]   ;;  %s37_s26 = int_to_ptr.hbm [resolvable:$true] %s36_s26 }
   0x3   :  { %s38_s28 = sshll.u32 %s5128_s27, 4  ;;  %s21_s8 = sshll.u32 %s5425_s1, 4  ;;  %s39_s28 = int_to_ptr.vmem [resolvable:$true] %s38_s28  ;;  %s22_s8 = int_to_ptr.hbm [resolvable:$true] %s21_s8 }
   0x4   :  { %s5129_s9 = smov 256   ;;  %s5130_s10 = smov 16  }
   0x5   :  { %44 = dma.hbm_to_vmem [thread:$0]  %s37_s26, 16384, %s39_s28, [#allocation9], %s5129_s9, %s5129_s9, %s5130_s10  }
   0x6   :  { %s5131_s11 = smov [#allocation5]   ;;  %s51_s15 = sshll.u32 %s5429_s5, 4  ;;  %s52_s15 = int_to_ptr.hbm [resolvable:$true] %s51_s15 }
   0x7   :  { %s23_s12 = sshll.u32 %s5131_s11, 4  ;;  %s5132_s3 = smov [#allocation10]   ;;  %s24_s12 = int_to_ptr.vmem [resolvable:$true] %s23_s12 }
   0x8   :  { %29 = dma.hbm_to_vmem [thread:$0]  %s22_s8, 25088, %s24_s12, [#allocation6], %s5129_s9, %s5129_s9, %s5130_s10  }
   0x9   :  { %s53_s16 = sshll.u32 %s5132_s3, 4  ;;  %s5133_s17 = smov 64   ;;  %s54_s16 = int_to_ptr.vmem [resolvable:$true] %s53_s16 }
   0xa   :  { %s5134_s18 = smov 4  }
   0xb   :  { %59 = dma.hbm_to_vmem [thread:$0]  %s52_s15, 4096, %s54_s16, [#allocation9], %s5133_s17, %s5133_s17, %s5134_s18  }
   0xc   :  { %5122 = dma.done.wait [#allocation6], 25088  }
   0xd   :  { %5123 = vsyncadd [#allocation6], 4294942208 }
   0xe   :  { %5124 = dma.done.wait [#allocation9], 20480  }
   0xf   :  { %5125 = vsyncadd [#allocation9], 4294946816  ;;  %v3295_v0 = vld [vmem:[#allocation5 + $0xe0] sm:$0xf]  ;;  %v4678_v1 = vld [vmem:[#allocation5 + $0xec] sm:$0xf0] }
  0x10   :  { %v3423_v2 = vld [vmem:[#allocation5 + $0x1e0] sm:$0xf]  ;;  %v3296_v3 = vor.u32 %v4678_v1, %v3295_v0  ;;  %v4710_v4 = vld [vmem:[#allocation5 + $0x1ec] sm:$0xf0]  ;;  %vm100_vm0 = vcmask 125952   ;;  %vm1335_vm1 = vcmask 130048  }
  0x11   :  { %v3551_v5 = vld [vmem:[#allocation5 + $0x2e0] sm:$0xf]  ;;  %v4742_v6 = vld [vmem:[#allocation5 + $0x2ec] sm:$0xf0]  ;;  %v3424_v7 = vor.u32 %v4710_v4, %v3423_v2  ;;  %s5135_s24 = smov [#allocation11]   ;;  %s3139_s28 = sshll.u32 %s5431_s7, 4  ;;  %s3140_s28 = int_to_ptr.hbm [resolvable:$true] %s3139_s28 }
  0x12   :  { %v3552_v8 = vor.u32 %v4742_v6, %v3551_v5  ;;  %v3679_v9 = vld [vmem:[#allocation5 + $0x3e0] sm:$0xf]  ;;  %v4774_v10 = vld [vmem:[#allocation5 + $0x3ec] sm:$0xf0]  ;;  %1339 = vmatpush.bf16.msra.mxu0 %v3296_v3  ;;  %s3137_s25 = sshll.u32 %s5135_s24, 4  ;;  %s3138_s25 = int_to_ptr.vmem [resolvable:$true] %s3137_s25 }
  0x13   :  { %v3279_v11 = vld [vmem:[#allocation5 + $0xc0] sm:$0xf]  ;;  %v3680_v12 = vor.u32 %v4774_v10, %v3679_v9  ;;  %v4674_v13 = vld [vmem:[#allocation5 + $0xcc] sm:$0xf0]  ;;  %1353 = vmatpush.bf16.msra.mxu1 %v3424_v7 }
  0x14   :  { %v3407_v14 = vld [vmem:[#allocation5 + $0x1c0] sm:$0xf]  ;;  %v4706_v15 = vld [vmem:[#allocation5 + $0x1cc] sm:$0xf0]  ;;  %1367 = vmatpush.bf16.msra.mxu2 %v3552_v8  ;;  %v3280_v16 = vor.u32 %v4674_v13, %v3279_v11 }
  0x15   :  { %v3408_v17 = vor.u32 %v4706_v15, %v3407_v14  ;;  %v3535_v18 = vld [vmem:[#allocation5 + $0x2c0] sm:$0xf]  ;;  %v4738_v19 = vld [vmem:[#allocation5 + $0x2cc] sm:$0xf0]  ;;  %1381 = vmatpush.bf16.msra.mxu3 %v3680_v12 }
  0x16   :  { %v3663_v20 = vld [vmem:[#allocation5 + $0x3c0] sm:$0xf]  ;;  %v3536_v21 = vor.u32 %v4738_v19, %v3535_v18  ;;  %v4770_v22 = vld [vmem:[#allocation5 + $0x3cc] sm:$0xf0]  ;;  %1340 = vmatpush.bf16.msra.mxu0 %v3280_v16 }
  0x17   :  { %v3263_v23 = vld [vmem:[#allocation5 + $0xa0] sm:$0xf]  ;;  %v4670_v24 = vld [vmem:[#allocation5 + $0xac] sm:$0xf0]  ;;  %v3664_v25 = vor.u32 %v4770_v22, %v3663_v20  ;;  %1354 = vmatpush.bf16.msra.mxu1 %v3408_v17 }
  0x18   :  { %v3391_v26 = vld [vmem:[#allocation5 + $0x1a0] sm:$0xf]  ;;  %v4702_v27 = vld [vmem:[#allocation5 + $0x1ac] sm:$0xf0]  ;;  %v3264_v29 = vor.u32 %v4670_v24, %v3263_v23  ;;  %1368 = vmatpush.bf16.msra.mxu2 %v3536_v21  ;;  %v77_v23 = vld [vmem:[%s5424_s0 + $0x10] sm:$0xff] }
  0x19   :  { %v3519_v28 = vld [vmem:[#allocation5 + $0x2a0] sm:$0xf]  ;;  %v4734_v30 = vld [vmem:[#allocation5 + $0x2ac] sm:$0xf0]  ;;  %v3392_v33 = vor.u32 %v4702_v27, %v3391_v26  ;;  %1382 = vmatpush.bf16.msra.mxu3 %v3664_v25 }
  0x1a   :  { %v3647_v31 = vld [vmem:[#allocation5 + $0x3a0] sm:$0xf]  ;;  %v4766_v32 = vld [vmem:[#allocation5 + $0x3ac] sm:$0xf0]  ;;  %v3520_v34 = vor.u32 %v4734_v30, %v3519_v28  ;;  %1341 = vmatpush.bf16.msra.mxu0 %v3264_v29 }
  0x1b   :  { %v3247_v35 = vld [vmem:[#allocation5 + $0x80] sm:$0xf]  ;;  %v4666_v36 = vld [vmem:[#allocation5 + $0x8c] sm:$0xf0]  ;;  %v3648_v38 = vor.u32 %v4766_v32, %v3647_v31  ;;  %1355 = vmatpush.bf16.msra.mxu1 %v3392_v33  ;;  %v85_v31 = vld [vmem:[%s5424_s0 + $0x50] sm:$0xff] }
  0x1c   :  { %v3375_v37 = vld [vmem:[#allocation5 + $0x180] sm:$0xf]  ;;  %v4698_v39 = vld [vmem:[#allocation5 + $0x18c] sm:$0xf0]  ;;  %v3248_v44 = vor.u32 %v4666_v36, %v3247_v35  ;;  %1369 = vmatpush.bf16.msra.mxu2 %v3520_v34 }
  0x1d   :  { %v3503_v40 = vld [vmem:[#allocation5 + $0x280] sm:$0xf]  ;;  %v4730_v41 = vld [vmem:[#allocation5 + $0x28c] sm:$0xf0]  ;;  %v3376_v45 = vor.u32 %v4698_v39, %v3375_v37  ;;  %1383 = vmatpush.bf16.msra.mxu3 %v3648_v38  ;;  %v75_v38 = vld [vmem:[%s5424_s0] sm:$0xff] }
  0x1e   :  { %v3631_v42 = vld [vmem:[#allocation5 + $0x380] sm:$0xf]  ;;  %v4762_v43 = vld [vmem:[#allocation5 + $0x38c] sm:$0xf0]  ;;  %v3504_v46 = vor.u32 %v4730_v41, %v3503_v40  ;;  %1342 = vmatpush.bf16.msra.mxu0 %v3248_v44  ;;  %v83_v44 = vld [vmem:[%s5424_s0 + $0x40] sm:$0xff] }
  0x1f   :  { %v3231_v47 = vld [vmem:[#allocation5 + $0x60] sm:$0xf]  ;;  %v4662_v48 = vld [vmem:[#allocation5 + $0x6c] sm:$0xf0]  ;;  %v3632_v50 = vor.u32 %v4762_v43, %v3631_v42  ;;  %1356 = vmatpush.bf16.msra.mxu1 %v3376_v45  ;;  %v4676_v42 = vld [vmem:[#allocation5 + $0xe4] sm:$0xf] }
  0x20   :  { %v3359_v49 = vld [vmem:[#allocation5 + $0x160] sm:$0xf]  ;;  %v4694_v51 = vld [vmem:[#allocation5 + $0x16c] sm:$0xf0]  ;;  %v3232_v56 = vor.u32 %v4662_v48, %v3231_v47  ;;  %1370 = vmatpush.bf16.msra.mxu2 %v3504_v46  ;;  %v3297_v43 = vld [vmem:[#allocation5 + $0xf0] sm:$0xf0] }
  0x21   :  { %v3487_v52 = vld [vmem:[#allocation5 + $0x260] sm:$0xf]  ;;  %v4726_v53 = vld [vmem:[#allocation5 + $0x26c] sm:$0xf0]  ;;  %v3360_v57 = vor.u32 %v4694_v51, %v3359_v49  ;;  %1384 = vmatpush.bf16.msra.mxu3 %v3632_v50 }
  0x22   :  { %v3615_v54 = vld [vmem:[#allocation5 + $0x360] sm:$0xf]  ;;  %v4758_v55 = vld [vmem:[#allocation5 + $0x36c] sm:$0xf0]  ;;  %v3488_v58 = vor.u32 %v4726_v53, %v3487_v52  ;;  %1343 = vmatpush.bf16.msra.mxu0 %v3232_v56  ;;  %v4708_v53 = vld [vmem:[#allocation5 + $0x1e4] sm:$0xf]  ;;  %v3300_v56 = vor.u32 %v4676_v42, %v3297_v43 }
  0x23   :  { %v3215_v59 = vld [vmem:[#allocation5 + $0x40] sm:$0xf]  ;;  %v4658_v60 = vld [vmem:[#allocation5 + $0x4c] sm:$0xf0]  ;;  %v3616_v62 = vor.u32 %v4758_v55, %v3615_v54  ;;  %1357 = vmatpush.bf16.msra.mxu1 %v3360_v57  ;;  %v3425_v54 = vld [vmem:[#allocation5 + $0x1f0] sm:$0xf0] }
  0x24   :  { %v3343_v61 = vld [vmem:[#allocation5 + $0x140] sm:$0xf]  ;;  %v4690_v63 = vld [vmem:[#allocation5 + $0x14c] sm:$0xf0]  ;;  %v3216_v4 = vor.u32 %v4658_v60, %v3215_v59  ;;  %1371 = vmatpush.bf16.msra.mxu2 %v3488_v58  ;;  %v3377_v42 = vld [vmem:[#allocation5 + $0x190] sm:$0xf0] }
  0x25   :  { %v3471_v0 = vld [vmem:[#allocation5 + $0x240] sm:$0xf]  ;;  %v4722_v1 = vld [vmem:[#allocation5 + $0x24c] sm:$0xf0]  ;;  %v3344_v6 = vor.u32 %v4690_v63, %v3343_v61  ;;  %1385 = vmatpush.bf16.msra.mxu3 %v3616_v62  ;;  %v4672_v62 = vld [vmem:[#allocation5 + $0xc4] sm:$0xf] }
  0x26   :  { %v3599_v2 = vld [vmem:[#allocation5 + $0x340] sm:$0xf]  ;;  %v4754_v3 = vld [vmem:[#allocation5 + $0x34c] sm:$0xf0]  ;;  %v3472_v7 = vor.u32 %v4722_v1, %v3471_v0  ;;  %1344 = vmatpush.bf16.msra.mxu0 %v3216_v4  ;;  %v3281_v63 = vld [vmem:[#allocation5 + $0xd0] sm:$0xf0] }
  0x27   :  { %v3199_v5 = vld [vmem:[#allocation5 + $0x20] sm:$0xf]  ;;  %v4654_v8 = vld [vmem:[#allocation5 + $0x2c] sm:$0xf0]  ;;  %v3600_v11 = vor.u32 %v4754_v3, %v3599_v2  ;;  %1358 = vmatpush.bf16.msra.mxu1 %v3344_v6  ;;  %v4704_v0 = vld [vmem:[#allocation5 + $0x1c4] sm:$0xf]  ;;  %v3428_v6 = vor.u32 %v4708_v53, %v3425_v54 }
  0x28   :  { %v3327_v9 = vld [vmem:[#allocation5 + $0x120] sm:$0xf]  ;;  %v4686_v10 = vld [vmem:[#allocation5 + $0x12c] sm:$0xf0]  ;;  %v3200_v18 = vor.u32 %v4654_v8, %v3199_v5  ;;  %1372 = vmatpush.bf16.msra.mxu2 %v3472_v7  ;;  %v3409_v1 = vld [vmem:[#allocation5 + $0x1d0] sm:$0xf0] }
  0x29   :  { %v3455_v12 = vld [vmem:[#allocation5 + $0x220] sm:$0xf]  ;;  %v4718_v13 = vld [vmem:[#allocation5 + $0x22c] sm:$0xf0]  ;;  %v3328_v25 = vor.u32 %v4686_v10, %v3327_v9  ;;  %1386 = vmatpush.bf16.msra.mxu3 %v3600_v11  ;;  %v4692_v54 = vld [vmem:[#allocation5 + $0x164] sm:$0xf] }
  0x2a   :  { %v3583_v14 = vld [vmem:[#allocation5 + $0x320] sm:$0xf]  ;;  %v4750_v15 = vld [vmem:[#allocation5 + $0x32c] sm:$0xf0]  ;;  %v3456_v26 = vor.u32 %v4718_v13, %v3455_v12  ;;  %1345 = vmatpush.bf16.msra.mxu0 %v3200_v18  ;;  %v3284_v13 = vor.u32 %v4672_v62, %v3281_v63  ;;  %v4656_v62 = vld [vmem:[#allocation5 + $0x44] sm:$0xf] }
  0x2b   :  { %v3183_v16 = vld [vmem:[#allocation5] sm:$0xf]  ;;  %v4650_v17 = vld [vmem:[#allocation5 + $0xc] sm:$0xf0]  ;;  %v3584_v33 = vor.u32 %v4750_v15, %v3583_v14  ;;  %1359 = vmatpush.bf16.msra.mxu1 %v3328_v25  ;;  %v3217_v63 = vld [vmem:[#allocation5 + $0x50] sm:$0xf0] }
  0x2c   :  { %v3311_v19 = vld [vmem:[#allocation5 + $0x100] sm:$0xf]  ;;  %v4682_v20 = vld [vmem:[#allocation5 + $0x10c] sm:$0xf0]  ;;  %v3184_v41 = vor.u32 %v4650_v17, %v3183_v16  ;;  %1373 = vmatpush.bf16.msra.mxu2 %v3456_v26  ;;  %v4668_v16 = vld [vmem:[#allocation5 + $0xa4] sm:$0xf] }
  0x2d   :  { %v3439_v21 = vld [vmem:[#allocation5 + $0x200] sm:$0xf]  ;;  %v4714_v22 = vld [vmem:[#allocation5 + $0x20c] sm:$0xf0]  ;;  %v3312_v46 = vor.u32 %v4682_v20, %v3311_v19  ;;  %1387 = vmatpush.bf16.msra.mxu3 %v3584_v33  ;;  %v3265_v19 = vld [vmem:[#allocation5 + $0xb0] sm:$0xf0] }
  0x2e   :  { %v78_v24 = vld [vmem:[%s5424_s0 + $0x18] sm:$0xff]  ;;  %v4746_v28 = vld [vmem:[#allocation5 + $0x30c] sm:$0xf0]  ;;  %v3440_v47 = vor.u32 %v4714_v22, %v3439_v21  ;;  %1346 = vmatpush.bf16.msra.mxu0 %v3184_v41  ;;  %v3412_v22 = vor.u32 %v4704_v0, %v3409_v1  ;;  %v3345_v1 = vld [vmem:[#allocation5 + $0x150] sm:$0xf0] }
  0x2f   :  { %v3567_v27 = vld [vmem:[#allocation5 + $0x300] sm:$0xf]  ;;  %v84_v30 = vld [vmem:[%s5424_s0 + $0x48] sm:$0xff]  ;;  %v90_v32 = vpack.c.bf16 %v78_v24, %v77_v23  ;;  %1360 = vmatpush.bf16.msra.mxu1 %v3312_v46  ;;  %v81_v23 = vld [vmem:[%s5424_s0 + $0x30] sm:$0xff] }
  0x30   :  { %v3807_v29 = vld [vmem:[#allocation5 + $0x4e0] sm:$0xf]  ;;  %v4806_v34 = vld [vmem:[#allocation5 + $0x4ec] sm:$0xf0]  ;;  %v94_v37 = vpack.c.bf16 %v85_v31, %v84_v30  ;;  %v3568_v51 = vor.u32 %v4746_v28, %v3567_v27  ;;  %1374 = vmatpush.bf16.msra.mxu2 %v3440_v47  ;;  %v4700_v27 = vld [vmem:[#allocation5 + $0x1a4] sm:$0xf]  ;;  %v3268_v31 = vor.u32 %v4668_v16, %v3265_v19 }
  0x31   :  { %v3935_v35 = vld [vmem:[#allocation5 + $0x5e0] sm:$0xf]  ;;  %v4838_v36 = vld [vmem:[#allocation5 + $0x5ec] sm:$0xf0]  ;;  %98 = vst [vmem:[#allocation2 + $0x8] sm:$0xff] %v90_v32  ;;  %v3808_v52 = vor.u32 %v4806_v34, %v3807_v29 }
  0x32   :  { %v76_v39 = vld [vmem:[%s5424_s0 + $0x8] sm:$0xff]  ;;  %v82_v40 = vld [vmem:[%s5424_s0 + $0x38] sm:$0xff]  ;;  %103 = vst [vmem:[#allocation2 + $0x24] sm:$0xff] %v94_v37  ;;  %v3936_v55 = vor.u32 %v4838_v36, %v3935_v35  ;;  %1388 = vmatpush.bf16.msra.mxu3 %v3568_v51 }
  0x33   :  { %v89_v45 = vpack.c.bf16 %v76_v39, %v75_v38  ;;  %v3951_v48 = vld [vmem:[#allocation5 + $0x600] sm:$0xf]  ;;  %v4842_v49 = vld [vmem:[#allocation5 + $0x60c] sm:$0xf0]  ;;  %v93_v50 = vpack.c.bf16 %v83_v44, %v82_v40  ;;  %1395 = vmatpush.bf16.msrb.mxu0 %v3808_v52  ;;  %v3393_v28 = vld [vmem:[#allocation5 + $0x1b0] sm:$0xf0]  ;;  %v92_v38 = vpack.c.bf16 %v81_v23, %v81_v23 }
  0x34   :  { %v3791_v57 = vld [vmem:[#allocation5 + $0x4c0] sm:$0xf]  ;;  %v4802_v58 = vld [vmem:[#allocation5 + $0x4cc] sm:$0xf0]  ;;  %v3952_v59 = vor.u32 %v4842_v49, %v3951_v48  ;;  %1409 = vmatpush.bf16.msrb.mxu1 %v3936_v55  ;;  %v4664_v36 = vld [vmem:[#allocation5 + $0x84] sm:$0xf]  ;;  %v3396_v39 = vor.u32 %v4700_v27, %v3393_v28 }
  0x35   :  { %97 = vst [vmem:[#allocation2] sm:$0xff] %v89_v45  ;;  %v3919_v60 = vld [vmem:[#allocation5 + $0x5c0] sm:$0xf]  ;;  %v4834_v61 = vld [vmem:[#allocation5 + $0x5cc] sm:$0xf0]  ;;  %v3792_v8 = vor.u32 %v4802_v58, %v3791_v57 }
  0x36   :  { %102 = vst [vmem:[#allocation2 + $0x1c] sm:$0xff] %v93_v50  ;;  %v3775_v4 = vld [vmem:[#allocation5 + $0x4a0] sm:$0xf]  ;;  %1437 = vmatpush.bf16.msrb.mxu3 %v3300_v56  ;;  %v4798_v9 = vld [vmem:[#allocation5 + $0x4ac] sm:$0xf0]  ;;  %1430 = vmatpush.bf16.msrb.mxu2 %v3952_v59  ;;  %v3920_v12 = vor.u32 %v4834_v61, %v3919_v60 }
  0x37   :  { %v3903_v14 = vld [vmem:[#allocation5 + $0x5a0] sm:$0xf]  ;;  %v4830_v15 = vld [vmem:[#allocation5 + $0x5ac] sm:$0xf0]  ;;  %1396 = vmatpush.bf16.msrb.mxu0 %v3792_v8  ;;  %v3776_v26 = vor.u32 %v4798_v9, %v3775_v4  ;;  %v3249_v37 = vld [vmem:[#allocation5 + $0x90] sm:$0xf0] }
  0x38   :  { %v3163_v2 = vld [vmem:[#allocation2 + $0x8] sm:$0xf]  ;;  %v4642_v3 = vld [vmem:[#allocation2 + $0xc] sm:$0xf]  ;;  %1410 = vmatpush.bf16.msrb.mxu1 %v3920_v12  ;;  %v3904_v30 = vor.u32 %v4830_v15, %v3903_v14  ;;  %v3759_v32 = vld [vmem:[#allocation5 + $0x480] sm:$0xf]  ;;  %v3252_v45 = vor.u32 %v4664_v36, %v3249_v37  ;;  %v3220_v12 = vor.u32 %v4656_v62, %v3217_v63 }
  0x39   :  { %v4645_v5 = vld [vmem:[#allocation2 + $0x20] sm:$0xf0]  ;;  %v3165_v7 = vld [vmem:[#allocation2 + $0x24] sm:$0xf0]  ;;  %v3887_v34 = vld [vmem:[#allocation5 + $0x580] sm:$0xf] }
  0x3a   :  { %v5212_v10 = vor.u32 %v4645_v5, %v3163_v2  ;;  %v5214_v11 = vor.u32 %v4642_v3, %v3165_v7  ;;  %v88_v29 = vld [vmem:[%s5424_s0 + $0x68] sm:$0xff]  ;;  %1438 = vmatpush.bf16.msrb.mxu3 %v3284_v13  ;;  %v4696_v41 = vld [vmem:[#allocation5 + $0x184] sm:$0xf]  ;;  %v3743_v46 = vld [vmem:[#allocation5 + $0x460] sm:$0xf] }
  0x3b   :  { %v4794_v33 = vld [vmem:[#allocation5 + $0x48c] sm:$0xf0]  ;;  %1397 = vmatpush.bf16.msrb.mxu0 %v3776_v26  ;;  %v96_v43 = vpack.c.bf16 %v88_v29, %v88_v29  ;;  %v3871_v48 = vld [vmem:[#allocation5 + $0x560] sm:$0xf]  ;;  %v4660_v50 = vld [vmem:[#allocation5 + $0x64] sm:$0xf]  ;;  %v3380_v52 = vor.u32 %v4696_v41, %v3377_v42 }
  0x3c   :  { %v3155_v17 = vld [vmem:[#allocation2] sm:$0xf]  ;;  %v4641_v18 = vld [vmem:[#allocation2 + $0x4] sm:$0xf]  ;;  %1375 = vmatmul.bf16.vlgmr.msra.gmra.mxu2 %v5212_v10  ;;  %1389 = vmatmul.bf16.vlgmr.msra.gmra.mxu3 %v5214_v11  ;;  %v4826_v35 = vld [vmem:[#allocation5 + $0x58c] sm:$0xf0]  ;;  %v3760_v40 = vor.u32 %v4794_v33, %v3759_v32 }
  0x3d   :  { %v4644_v20 = vld [vmem:[#allocation2 + $0x18] sm:$0xf0]  ;;  %v3157_v21 = vld [vmem:[#allocation2 + $0x1c] sm:$0xf0]  ;;  %1451 = vmatpush.bf16.msra.mxu2 %v3428_v6  ;;  %1411 = vmatpush.bf16.msrb.mxu1 %v3904_v30  ;;  %v3888_v44 = vor.u32 %v4826_v35, %v3887_v34  ;;  %v4790_v47 = vld [vmem:[#allocation5 + $0x46c] sm:$0xf0] }
  0x3e   :  { %v5221_v24 = vor.u32 %v4644_v20, %v3155_v17  ;;  %v5223_v25 = vor.u32 %v4641_v18, %v3157_v21  ;;  %1439 = vmatpush.bf16.msrb.mxu3 %v3268_v31  ;;  %v4822_v49 = vld [vmem:[#allocation5 + $0x56c] sm:$0xf0]  ;;  %v3233_v51 = vld [vmem:[#allocation5 + $0x70] sm:$0xf0]  ;;  %101 = vst.msk [vmem:[#allocation2 + $0x18] sm:$0xf] %vm100_vm0, %v92_v38  ;;  %v3744_v53 = vor.u32 %v4790_v47, %v3743_v46 }
  0x3f   :  { %1398 = vmatpush.bf16.msrb.mxu0 %v3760_v40  ;;  %v3361_v55 = vld [vmem:[#allocation5 + $0x170] sm:$0xf0]  ;;  %105 = vst.msk [vmem:[#allocation2 + $0x34] sm:$0xf] %vm100_vm0, %v96_v43  ;;  %v3872_v56 = vor.u32 %v4822_v49, %v3871_v48  ;;  %v3236_v57 = vor.u32 %v4660_v50, %v3233_v51  ;;  %v3727_v58 = vld [vmem:[#allocation5 + $0x440] sm:$0xf] }
  0x40   :  { %1347 = vmatmul.bf16.vlgmr.msra.gmra.mxu0 %v5221_v24  ;;  %1361 = vmatmul.bf16.vlgmr.msra.gmra.mxu1 %v5223_v25  ;;  %v4786_v59 = vld [vmem:[#allocation5 + $0x44c] sm:$0xf0]  ;;  %v3855_v60 = vld [vmem:[#allocation5 + $0x540] sm:$0xf]  ;;  %v4688_v0 = vld [vmem:[#allocation5 + $0x144] sm:$0xf]  ;;  %v3364_v4 = vor.u32 %v4692_v54, %v3361_v55 }
  0x41   :  { %1452 = vmatpush.bf16.msra.mxu2 %v3412_v22  ;;  %1412 = vmatpush.bf16.msrb.mxu1 %v3888_v44  ;;  %v4818_v61 = vld [vmem:[#allocation5 + $0x54c] sm:$0xf0]  ;;  %v3711_v2 = vld [vmem:[#allocation5 + $0x420] sm:$0xf]  ;;  %v79_v3 = vld [vmem:[%s5424_s0 + $0x20] sm:$0xff]  ;;  %v3728_v5 = vor.u32 %v4786_v59, %v3727_v58  ;;  %v3348_v27 = vor.u32 %v4688_v0, %v3345_v1 }
  0x42   :  { %1440 = vmatpush.bf16.msrb.mxu3 %v3252_v45  ;;  %v4782_v6 = vld [vmem:[#allocation5 + $0x42c] sm:$0xf0]  ;;  %v3839_v7 = vld [vmem:[#allocation5 + $0x520] sm:$0xf]  ;;  %v3856_v9 = vor.u32 %v4818_v61, %v3855_v60  ;;  %v4652_v13 = vld [vmem:[#allocation5 + $0x24] sm:$0xf] }
  0x43   :  { %1399 = vmatpush.bf16.msrb.mxu0 %v3744_v53  ;;  %v4814_v8 = vld [vmem:[#allocation5 + $0x52c] sm:$0xf0]  ;;  %v3201_v14 = vld [vmem:[#allocation5 + $0x30] sm:$0xf0]  ;;  %v86_v17 = vld [vmem:[%s5424_s0 + $0x58] sm:$0xff]  ;;  %v3712_v28 = vor.u32 %v4782_v6, %v3711_v2 }
  0x44   :  { %v80_v15 = vld [vmem:[%s5424_s0 + $0x28] sm:$0xff]  ;;  %v87_v18 = vld [vmem:[%s5424_s0 + $0x60] sm:$0xff]  ;;  %v4684_v21 = vld [vmem:[#allocation5 + $0x124] sm:$0xf]  ;;  %v3840_v32 = vor.u32 %v4814_v8, %v3839_v7  ;;  %v3204_v33 = vor.u32 %v4652_v13, %v3201_v14 }
  0x45   :  { %1453 = vmatpush.bf16.msra.mxu2 %v3396_v39  ;;  %1413 = vmatpush.bf16.msrb.mxu1 %v3872_v56  ;;  %v3179_v16 = vld [vmem:[#allocation2 + $0x18] sm:$0xf]  ;;  %v91_v19 = vpack.c.bf16 %v80_v15, %v79_v3  ;;  %v3329_v22 = vld [vmem:[#allocation5 + $0x130] sm:$0xf0]  ;;  %v95_v26 = vpack.c.bf16 %v87_v18, %v86_v17  ;;  %v4778_v30 = vld [vmem:[#allocation5 + $0x40c] sm:$0xf0] }
  0x46   :  { %1441 = vmatpush.bf16.msrb.mxu3 %v3236_v57  ;;  %v4647_v20 = vld [vmem:[#allocation2 + $0x30] sm:$0xf0]  ;;  %v3695_v23 = vld [vmem:[#allocation5 + $0x400] sm:$0xf]  ;;  %v4810_v34 = vld [vmem:[#allocation5 + $0x50c] sm:$0xf0]  ;;  %v3332_v42 = vor.u32 %v4684_v21, %v3329_v22 }
  0x47   :  { %1400 = vmatpush.bf16.msrb.mxu0 %v3728_v5  ;;  %v5244_v29 = vor.u32 %v4647_v20, %v3179_v16  ;;  %v3823_v31 = vld [vmem:[#allocation5 + $0x500] sm:$0xf]  ;;  %99 = vst [vmem:[#allocation2 + $0x10] sm:$0xff] %v91_v19  ;;  %v4648_v35 = vld [vmem:[#allocation5 + $0x4] sm:$0xf]  ;;  %v3696_v43 = vor.u32 %v4778_v30, %v3695_v23 }
  0x48   :  { %104 = vst [vmem:[#allocation2 + $0x2c] sm:$0xff] %v95_v26  ;;  %v3185_v36 = vld [vmem:[#allocation5 + $0x10] sm:$0xf0]  ;;  %v4740_v37 = vld [vmem:[#allocation5 + $0x2e4] sm:$0xf]  ;;  %v3824_v47 = vor.u32 %v4810_v34, %v3823_v31 }
  0x49   :  { %1454 = vmatpush.bf16.msra.mxu2 %v3380_v52  ;;  %1414 = vmatpush.bf16.msrb.mxu1 %v3856_v9  ;;  %v3553_v38 = vld [vmem:[#allocation5 + $0x2f0] sm:$0xf0]  ;;  %v4772_v39 = vld [vmem:[#allocation5 + $0x3e4] sm:$0xf]  ;;  %v3188_v48 = vor.u32 %v4648_v35, %v3185_v36 }
  0x4a   :  { %1442 = vmatpush.bf16.msrb.mxu3 %v3220_v12  ;;  %v3681_v40 = vld [vmem:[#allocation5 + $0x3f0] sm:$0xf0]  ;;  %v4804_v41 = vld [vmem:[#allocation5 + $0x4e4] sm:$0xf]  ;;  %v3556_v52 = vor.u32 %v4740_v37, %v3553_v38 }
  0x4b   :  { %1401 = vmatpush.bf16.msrb.mxu0 %v3712_v28  ;;  %v3809_v44 = vld [vmem:[#allocation5 + $0x4f0] sm:$0xf0]  ;;  %v4680_v45 = vld [vmem:[#allocation5 + $0x104] sm:$0xf]  ;;  %v3684_v53 = vor.u32 %v4772_v39, %v3681_v40 }
  0x4c   :  { %3965 = vmatmul.msk.bf16.vlgmr.msrb.gmra.mxu2 %vm1335_vm1, %v5244_v29  ;;  %v3313_v46 = vld [vmem:[#allocation5 + $0x110] sm:$0xf0]  ;;  %v4836_v49 = vld [vmem:[#allocation5 + $0x5e4] sm:$0xf]  ;;  %v3812_v57 = vor.u32 %v4804_v41, %v3809_v44 }
  0x4d   :  { %1455 = vmatpush.bf16.msra.mxu2 %v3364_v4  ;;  %1415 = vmatpush.bf16.msrb.mxu1 %v3840_v32  ;;  %v3937_v50 = vld [vmem:[#allocation5 + $0x5f0] sm:$0xf0]  ;;  %v4736_v51 = vld [vmem:[#allocation5 + $0x2c4] sm:$0xf]  ;;  %v3316_v62 = vor.u32 %v4680_v45, %v3313_v46 }
  0x4e   :  { %1443 = vmatpush.bf16.msrb.mxu3 %v3204_v33  ;;  %v3537_v54 = vld [vmem:[#allocation5 + $0x2d0] sm:$0xf0]  ;;  %v4768_v55 = vld [vmem:[#allocation5 + $0x3c4] sm:$0xf]  ;;  %v3171_v58 = vld [vmem:[#allocation2 + $0x10] sm:$0xf]  ;;  %v3940_v2 = vor.u32 %v4836_v49, %v3937_v50 }
  0x4f   :  { %v3665_v56 = vld [vmem:[#allocation5 + $0x3d0] sm:$0xf0]  ;;  %v4643_v59 = vld [vmem:[#allocation2 + $0x14] sm:$0xf]  ;;  %v4800_v60 = vld [vmem:[#allocation5 + $0x4c4] sm:$0xf]  ;;  %1402 = vmatpush.bf16.msrb.mxu0 %v3696_v43  ;;  %v3540_v4 = vor.u32 %v4736_v51, %v3537_v54 }
  0x50   :  { %v4646_v61 = vld [vmem:[#allocation2 + $0x28] sm:$0xf0]  ;;  %v3173_v63 = vld [vmem:[#allocation2 + $0x2c] sm:$0xf0]  ;;  %v3668_v5 = vor.u32 %v4768_v55, %v3665_v56  ;;  %v4832_v6 = vld [vmem:[#allocation5 + $0x5c4] sm:$0xf] }
  0x51   :  { %1456 = vmatpush.bf16.msra.mxu2 %v3348_v27  ;;  %v3793_v0 = vld [vmem:[#allocation5 + $0x4d0] sm:$0xf0]  ;;  %1416 = vmatpush.bf16.msrb.mxu1 %v3824_v47  ;;  %v5248_v1 = vor.u32 %v4646_v61, %v3171_v58  ;;  %v5250_v3 = vor.u32 %v4643_v59, %v3173_v63  ;;  %v4732_v8 = vld [vmem:[#allocation5 + $0x2a4] sm:$0xf] }
  0x52   :  { %1444 = vmatpush.bf16.msrb.mxu3 %v3188_v48  ;;  %v3921_v7 = vld [vmem:[#allocation5 + $0x5d0] sm:$0xf0]  ;;  %v3796_v9 = vor.u32 %v4800_v60, %v3793_v0  ;;  %v4764_v13 = vld [vmem:[#allocation5 + $0x3a4] sm:$0xf] }
  0x53   :  { %1465 = vmatpush.bf16.msra.mxu0 %v3556_v52  ;;  %v3521_v12 = vld [vmem:[#allocation5 + $0x2b0] sm:$0xf0]  ;;  %v4796_v15 = vld [vmem:[#allocation5 + $0x4a4] sm:$0xf]  ;;  %v3924_v17 = vor.u32 %v4832_v6, %v3921_v7 }
  0x54   :  { %1403 = vmatmul.bf16.vlgmr.msrb.gmra.mxu0 %v5248_v1  ;;  %v3649_v14 = vld [vmem:[#allocation5 + $0x3b0] sm:$0xf0]  ;;  %1417 = vmatmul.bf16.vlgmr.msrb.gmra.mxu1 %v5250_v3  ;;  %v3524_v18 = vor.u32 %v4732_v8, %v3521_v12  ;;  %v4828_v20 = vld [vmem:[#allocation5 + $0x5a4] sm:$0xf] }
  0x55   :  { %1457 = vmatpush.bf16.msra.mxu2 %v3332_v42  ;;  %1479 = vmatpush.bf16.msra.mxu1 %v3684_v53  ;;  %v3777_v16 = vld [vmem:[#allocation5 + $0x4b0] sm:$0xf0]  ;;  %v3652_v19 = vor.u32 %v4764_v13, %v3649_v14  ;;  %v4728_v22 = vld [vmem:[#allocation5 + $0x284] sm:$0xf] }
  0x56   :  { %1493 = vmatpush.bf16.msra.mxu3 %v3812_v57  ;;  %v3905_v21 = vld [vmem:[#allocation5 + $0x5b0] sm:$0xf0]  ;;  %v3780_v23 = vor.u32 %v4796_v15, %v3777_v16  ;;  %v4760_v27 = vld [vmem:[#allocation5 + $0x384] sm:$0xf] }
  0x57   :  { %1445 = vmatmul.bf16.vlgmr.msrb.gmra.mxu3 %v5221_v24  ;;  %1466 = vmatpush.bf16.msra.mxu0 %v3540_v4  ;;  %v3505_v26 = vld [vmem:[#allocation5 + $0x290] sm:$0xf0]  ;;  %v4792_v30 = vld [vmem:[#allocation5 + $0x484] sm:$0xf]  ;;  %v3908_v32 = vor.u32 %v4828_v20, %v3905_v21  ;;  %v3303_v20 = vld [vmem:[#allocation5 + $0xe8] sm:$0xf] }
  0x58   :  { %v3633_v28 = vld [vmem:[#allocation5 + $0x390] sm:$0xf0]  ;;  %v3508_v33 = vor.u32 %v4728_v22, %v3505_v26  ;;  %v4824_v35 = vld [vmem:[#allocation5 + $0x584] sm:$0xf]  ;;  %v4679_v21 = vld [vmem:[#allocation5 + $0xf4] sm:$0xf0] }
  0x59   :  { %1458 = vmatpush.bf16.msra.mxu2 %v3316_v62  ;;  %1480 = vmatpush.bf16.msra.mxu1 %v3668_v5  ;;  %v3761_v31 = vld [vmem:[#allocation5 + $0x490] sm:$0xf0]  ;;  %v3636_v34 = vor.u32 %v4760_v27, %v3633_v28  ;;  %v4724_v37 = vld [vmem:[#allocation5 + $0x264] sm:$0xf]  ;;  %v3559_v27 = vld [vmem:[#allocation5 + $0x2e8] sm:$0xf] }
  0x5a   :  { %1494 = vmatpush.bf16.msra.mxu3 %v3796_v9  ;;  %v3889_v36 = vld [vmem:[#allocation5 + $0x590] sm:$0xf0]  ;;  %v3764_v38 = vor.u32 %v4792_v30, %v3761_v31  ;;  %v4756_v40 = vld [vmem:[#allocation5 + $0x364] sm:$0xf]  ;;  %v4743_v28 = vld [vmem:[#allocation5 + $0x2f4] sm:$0xf0] }
  0x5b   :  { %1467 = vmatpush.bf16.msra.mxu0 %v3524_v18  ;;  %v3489_v39 = vld [vmem:[#allocation5 + $0x270] sm:$0xf0]  ;;  %v4788_v42 = vld [vmem:[#allocation5 + $0x464] sm:$0xf]  ;;  %v3892_v44 = vor.u32 %v4824_v35, %v3889_v36  ;;  %v3304_v35 = vor.u32 %v4679_v21, %v3303_v20  ;;  %v3687_v36 = vld [vmem:[#allocation5 + $0x3e8] sm:$0xf] }
  0x5c   :  { %1459 = vmatmul.bf16.vlgmr.msra.gmra.mxu2 %v5223_v25  ;;  %v3617_v41 = vld [vmem:[#allocation5 + $0x370] sm:$0xf0]  ;;  %v3492_v45 = vor.u32 %v4724_v37, %v3489_v39  ;;  %v4820_v47 = vld [vmem:[#allocation5 + $0x564] sm:$0xf]  ;;  %v4775_v37 = vld [vmem:[#allocation5 + $0x3f4] sm:$0xf0] }
  0x5d   :  { %1507 = vmatpush.bf16.msrb.mxu2 %v3940_v2  ;;  %1481 = vmatpush.bf16.msra.mxu1 %v3652_v19  ;;  %v3745_v43 = vld [vmem:[#allocation5 + $0x470] sm:$0xf0]  ;;  %v3620_v46 = vor.u32 %v4756_v40, %v3617_v41  ;;  %v4720_v49 = vld [vmem:[#allocation5 + $0x244] sm:$0xf]  ;;  %v3431_v39 = vld [vmem:[#allocation5 + $0x1e8] sm:$0xf]  ;;  %v3560_v41 = vor.u32 %v4743_v28, %v3559_v27 }
  0x5e   :  { %1495 = vmatpush.bf16.msra.mxu3 %v3780_v23  ;;  %v3873_v48 = vld [vmem:[#allocation5 + $0x570] sm:$0xf0]  ;;  %v3748_v50 = vor.u32 %v4788_v42, %v3745_v43  ;;  %v4752_v52 = vld [vmem:[#allocation5 + $0x344] sm:$0xf]  ;;  %v4711_v40 = vld [vmem:[#allocation5 + $0x1f4] sm:$0xf0] }
  0x5f   :  { %1468 = vmatpush.bf16.msra.mxu0 %v3508_v33  ;;  %v3473_v51 = vld [vmem:[#allocation5 + $0x250] sm:$0xf0]  ;;  %v4784_v54 = vld [vmem:[#allocation5 + $0x444] sm:$0xf]  ;;  %v3876_v56 = vor.u32 %v4820_v47, %v3873_v48  ;;  %v3287_v43 = vld [vmem:[#allocation5 + $0xc8] sm:$0xf]  ;;  %v3432_v48 = vor.u32 %v4711_v40, %v3431_v39 }
  0x60   :  { %v3601_v53 = vld [vmem:[#allocation5 + $0x350] sm:$0xf0]  ;;  %v3476_v57 = vor.u32 %v4720_v49, %v3473_v51  ;;  %v4816_v59 = vld [vmem:[#allocation5 + $0x544] sm:$0xf]  ;;  %v4739_v47 = vld [vmem:[#allocation5 + $0x2d4] sm:$0xf0] }
  0x61   :  { %1508 = vmatpush.bf16.msrb.mxu2 %v3924_v17  ;;  %1482 = vmatpush.bf16.msra.mxu1 %v3636_v34  ;;  %v3729_v55 = vld [vmem:[#allocation5 + $0x450] sm:$0xf0]  ;;  %v3604_v58 = vor.u32 %v4752_v52, %v3601_v53  ;;  %v4716_v61 = vld [vmem:[#allocation5 + $0x224] sm:$0xf]  ;;  %v3671_v49 = vld [vmem:[#allocation5 + $0x3c8] sm:$0xf] }
  0x62   :  { %1496 = vmatpush.bf16.msra.mxu3 %v3764_v38  ;;  %v3857_v60 = vld [vmem:[#allocation5 + $0x550] sm:$0xf0]  ;;  %v3732_v62 = vor.u32 %v4784_v54, %v3729_v55  ;;  %v4748_v0 = vld [vmem:[#allocation5 + $0x324] sm:$0xf]  ;;  %v3415_v52 = vld [vmem:[#allocation5 + $0x1c8] sm:$0xf] }
  0x63   :  { %1469 = vmatpush.bf16.msra.mxu0 %v3492_v45  ;;  %v3457_v63 = vld [vmem:[#allocation5 + $0x230] sm:$0xf0]  ;;  %v4780_v4 = vld [vmem:[#allocation5 + $0x424] sm:$0xf]  ;;  %v3860_v6 = vor.u32 %v4816_v59, %v3857_v60  ;;  %v3688_v45 = vor.u32 %v4775_v37, %v3687_v36  ;;  %v4707_v53 = vld [vmem:[#allocation5 + $0x1d4] sm:$0xf0] }
  0x64   :  { %v3585_v2 = vld [vmem:[#allocation5 + $0x330] sm:$0xf0]  ;;  %v4812_v7 = vld [vmem:[#allocation5 + $0x524] sm:$0xf]  ;;  %v3460_v9 = vor.u32 %v4716_v61, %v3457_v63  ;;  %v3271_v55 = vld [vmem:[#allocation5 + $0xa8] sm:$0xf]  ;;  %v3416_v60 = vor.u32 %v4707_v53, %v3415_v52 }
  0x65   :  { %1509 = vmatpush.bf16.msrb.mxu2 %v3908_v32  ;;  %1483 = vmatpush.bf16.msra.mxu1 %v3620_v46  ;;  %v3713_v5 = vld [vmem:[#allocation5 + $0x430] sm:$0xf0]  ;;  %v3588_v12 = vor.u32 %v4748_v0, %v3585_v2  ;;  %v4712_v13 = vld [vmem:[#allocation5 + $0x204] sm:$0xf]  ;;  %v3543_v46 = vld [vmem:[#allocation5 + $0x2c8] sm:$0xf] }
  0x66   :  { %1497 = vmatpush.bf16.msra.mxu3 %v3748_v50  ;;  %v3841_v8 = vld [vmem:[#allocation5 + $0x530] sm:$0xf0]  ;;  %v4744_v15 = vld [vmem:[#allocation5 + $0x304] sm:$0xf]  ;;  %v3716_v16 = vor.u32 %v4780_v4, %v3713_v5  ;;  %v4771_v50 = vld [vmem:[#allocation5 + $0x3d4] sm:$0xf0]  ;;  %v3544_v54 = vor.u32 %v4739_v47, %v3543_v46 }
  0x67   :  { %1470 = vmatpush.bf16.msra.mxu0 %v3476_v57  ;;  %v3441_v14 = vld [vmem:[#allocation5 + $0x210] sm:$0xf0]  ;;  %v4776_v18 = vld [vmem:[#allocation5 + $0x404] sm:$0xf]  ;;  %v3844_v23 = vor.u32 %v4812_v7, %v3841_v8  ;;  %v3672_v57 = vor.u32 %v4771_v50, %v3671_v49  ;;  %v4735_v59 = vld [vmem:[#allocation5 + $0x2b4] sm:$0xf0] }
  0x68   :  { %v3569_v17 = vld [vmem:[#allocation5 + $0x310] sm:$0xf0]  ;;  %v4840_v22 = vld [vmem:[#allocation5 + $0x604] sm:$0xf]  ;;  %v3444_v30 = vor.u32 %v4712_v13, %v3441_v14  ;;  %v3655_v61 = vld [vmem:[#allocation5 + $0x3a8] sm:$0xf] }
  0x69   :  { %1510 = vmatpush.bf16.msrb.mxu2 %v3892_v44  ;;  %1484 = vmatpush.bf16.msra.mxu1 %v3604_v58  ;;  %v3697_v19 = vld [vmem:[#allocation5 + $0x410] sm:$0xf0]  ;;  %v3572_v31 = vor.u32 %v4744_v15, %v3569_v17  ;;  %v4808_v32 = vld [vmem:[#allocation5 + $0x504] sm:$0xf]  ;;  %v4675_v44 = vld [vmem:[#allocation5 + $0xd4] sm:$0xf0] }
  0x6a   :  { %1498 = vmatpush.bf16.msra.mxu3 %v3732_v62  ;;  %v3953_v26 = vld [vmem:[#allocation5 + $0x610] sm:$0xf0]  ;;  %v3700_v34 = vor.u32 %v4776_v18, %v3697_v19  ;;  %v3288_v51 = vor.u32 %v4675_v44, %v3287_v43  ;;  %v3527_v58 = vld [vmem:[#allocation5 + $0x2a8] sm:$0xf]  ;;  %v4767_v62 = vld [vmem:[#allocation5 + $0x3b4] sm:$0xf0] }
  0x6b   :  { %1471 = vmatpush.bf16.msra.mxu0 %v3460_v9  ;;  %v3825_v33 = vld [vmem:[#allocation5 + $0x510] sm:$0xf0]  ;;  %v3956_v38 = vor.u32 %v4840_v22, %v3953_v26  ;;  %v3399_v0 = vld [vmem:[#allocation5 + $0x1a8] sm:$0xf]  ;;  %v4703_v2 = vld [vmem:[#allocation5 + $0x1b4] sm:$0xf0]  ;;  %v3528_v4 = vor.u32 %v4735_v59, %v3527_v58  ;;  %v3656_v7 = vor.u32 %v4767_v62, %v3655_v61 }
  0x6c   :  { %v3828_v42 = vor.u32 %v4808_v32, %v3825_v33  ;;  %v3255_v5 = vld [vmem:[#allocation5 + $0x88] sm:$0xf]  ;;  %v4731_v9 = vld [vmem:[#allocation5 + $0x294] sm:$0xf0] }
  0x6d   :  { %1511 = vmatpush.bf16.msrb.mxu2 %v3876_v56  ;;  %1485 = vmatpush.bf16.msra.mxu1 %v3588_v12  ;;  %v4671_v56 = vld [vmem:[#allocation5 + $0xb4] sm:$0xf0]  ;;  %v3511_v8 = vld [vmem:[#allocation5 + $0x288] sm:$0xf]  ;;  %v3400_v12 = vor.u32 %v4703_v2, %v3399_v0 }
  0x6e   :  { %1499 = vmatpush.bf16.msra.mxu3 %v3716_v16  ;;  %v3272_v63 = vor.u32 %v4671_v56, %v3271_v55  ;;  %v3639_v13 = vld [vmem:[#allocation5 + $0x388] sm:$0xf]  ;;  %v4763_v14 = vld [vmem:[#allocation5 + $0x394] sm:$0xf0]  ;;  %v3512_v18 = vor.u32 %v4731_v9, %v3511_v8 }
  0x6f   :  { %1472 = vmatpush.bf16.msra.mxu0 %v3444_v30  ;;  %v3383_v16 = vld [vmem:[#allocation5 + $0x188] sm:$0xf]  ;;  %v4699_v17 = vld [vmem:[#allocation5 + $0x194] sm:$0xf0]  ;;  %v3640_v21 = vor.u32 %v4763_v14, %v3639_v13  ;;  %v4677_v13 = vld [vmem:[#allocation5 + $0xec] sm:$0xf] }
  0x70   :  { %v3239_v19 = vld [vmem:[#allocation5 + $0x68] sm:$0xf]  ;;  %v4663_v20 = vld [vmem:[#allocation5 + $0x74] sm:$0xf0]  ;;  %v3384_v26 = vor.u32 %v4699_v17, %v3383_v16  ;;  %v3305_v14 = vld [vmem:[#allocation5 + $0xf8] sm:$0xf0] }
  0x71   :  { %1512 = vmatpush.bf16.msrb.mxu2 %v3860_v6  ;;  %1486 = vmatpush.bf16.msra.mxu1 %v3572_v31  ;;  %v4667_v6 = vld [vmem:[#allocation5 + $0x94] sm:$0xf0]  ;;  %v3495_v22 = vld [vmem:[#allocation5 + $0x268] sm:$0xf]  ;;  %v3240_v30 = vor.u32 %v4663_v20, %v3239_v19 }
  0x72   :  { %1500 = vmatpush.bf16.msra.mxu3 %v3700_v34  ;;  %1473 = vmatmul.bf16.vlgmr.msra.gmra.mxu0 %v5212_v10  ;;  %v3256_v15 = vor.u32 %v4667_v6, %v3255_v5  ;;  %v3623_v27 = vld [vmem:[#allocation5 + $0x368] sm:$0xf]  ;;  %v4759_v28 = vld [vmem:[#allocation5 + $0x374] sm:$0xf0] }
  0x73   :  { %1563 = vmatpush.bf16.msrb.mxu0 %v3560_v41  ;;  %v3367_v31 = vld [vmem:[#allocation5 + $0x168] sm:$0xf]  ;;  %v4695_v32 = vld [vmem:[#allocation5 + $0x174] sm:$0xf0]  ;;  %v3624_v36 = vor.u32 %v4759_v28, %v3623_v27  ;;  %v3308_v28 = vor.u32 %v4677_v13, %v3305_v14 }
  0x74   :  { %1487 = vmatmul.bf16.vlgmr.msra.gmra.mxu1 %v5214_v11  ;;  %v3223_v34 = vld [vmem:[#allocation5 + $0x48] sm:$0xf]  ;;  %v3368_v39 = vor.u32 %v4695_v32, %v3367_v31  ;;  %v4755_v41 = vld [vmem:[#allocation5 + $0x354] sm:$0xf0]  ;;  %v4673_v31 = vld [vmem:[#allocation5 + $0xcc] sm:$0xf] }
  0x75   :  { %1513 = vmatpush.bf16.msrb.mxu2 %v3844_v23  ;;  %1535 = vmatpush.bf16.msrb.mxu1 %v3304_v35  ;;  %v4727_v23 = vld [vmem:[#allocation5 + $0x274] sm:$0xf0]  ;;  %v3479_v37 = vld [vmem:[#allocation5 + $0x248] sm:$0xf]  ;;  %v3289_v32 = vld [vmem:[#allocation5 + $0xd8] sm:$0xf0] }
  0x76   :  { %1528 = vmatpush.bf16.msrb.mxu3 %v3956_v38  ;;  %v3496_v33 = vor.u32 %v4727_v23, %v3495_v22  ;;  %v4659_v35 = vld [vmem:[#allocation5 + $0x54] sm:$0xf0]  ;;  %v3607_v40 = vld [vmem:[#allocation5 + $0x348] sm:$0xf]  ;;  %v4709_v23 = vld [vmem:[#allocation5 + $0x1ec] sm:$0xf] }
  0x77   :  { %1501 = vmatmul.bf16.vlgmr.msra.gmra.mxu3 %v5248_v1  ;;  %1564 = vmatpush.bf16.msrb.mxu0 %v3544_v54  ;;  %v4723_v38 = vld [vmem:[#allocation5 + $0x254] sm:$0xf0]  ;;  %v3351_v43 = vld [vmem:[#allocation5 + $0x148] sm:$0xf] }
  0x78   :  { %v4691_v44 = vld [vmem:[#allocation5 + $0x154] sm:$0xf0]  ;;  %v3207_v46 = vld [vmem:[#allocation5 + $0x28] sm:$0xf] }
  0x79   :  { %1514 = vmatpush.bf16.msrb.mxu2 %v3828_v42  ;;  %1536 = vmatpush.bf16.msrb.mxu1 %v3288_v51  ;;  %v3224_v42 = vor.u32 %v4659_v35, %v3223_v34  ;;  %v4655_v47 = vld [vmem:[#allocation5 + $0x34] sm:$0xf0]  ;;  %v3463_v49 = vld [vmem:[#allocation5 + $0x228] sm:$0xf]  ;;  %v3352_v51 = vor.u32 %v4691_v44, %v3351_v43  ;;  %v4669_v43 = vld [vmem:[#allocation5 + $0xac] sm:$0xf] }
  0x7a   :  { %1549 = vmatpush.bf16.msra.mxu3 %v3432_v48  ;;  %v3608_v48 = vor.u32 %v4755_v41, %v3607_v40  ;;  %v4719_v50 = vld [vmem:[#allocation5 + $0x234] sm:$0xf0]  ;;  %v3335_v52 = vld [vmem:[#allocation5 + $0x128] sm:$0xf]  ;;  %v3208_v55 = vor.u32 %v4655_v47, %v3207_v46  ;;  %v3417_v40 = vld [vmem:[#allocation5 + $0x1d8] sm:$0xf0]  ;;  %v3292_v41 = vor.u32 %v4673_v31, %v3289_v32 }
  0x7b   :  { %1565 = vmatpush.bf16.msrb.mxu0 %v3528_v4  ;;  %v3591_v53 = vld [vmem:[#allocation5 + $0x328] sm:$0xf]  ;;  %v4751_v54 = vld [vmem:[#allocation5 + $0x334] sm:$0xf0]  ;;  %v3464_v58 = vor.u32 %v4719_v50, %v3463_v49  ;;  %v3273_v44 = vld [vmem:[#allocation5 + $0xb8] sm:$0xf0] }
  0x7c   :  { %1515 = vmatmul.bf16.vlgmr.msrb.gmra.mxu2 %v5250_v3  ;;  %v4687_v56 = vld [vmem:[#allocation5 + $0x134] sm:$0xf0]  ;;  %v3592_v62 = vor.u32 %v4751_v54, %v3591_v53  ;;  %v3447_v0 = vld [vmem:[#allocation5 + $0x208] sm:$0xf]  ;;  %v3276_v53 = vor.u32 %v4669_v43, %v3273_v44  ;;  %v3353_v31 = vld [vmem:[#allocation5 + $0x158] sm:$0xf0] }
  0x7d   :  { %1577 = vmatpush.bf16.msra.mxu2 %v3688_v45  ;;  %1537 = vmatpush.bf16.msrb.mxu1 %v3272_v63  ;;  %v3480_v45 = vor.u32 %v4723_v38, %v3479_v37  ;;  %v4651_v59 = vld [vmem:[#allocation5 + $0x14] sm:$0xf0]  ;;  %v3319_v63 = vld [vmem:[#allocation5 + $0x108] sm:$0xf]  ;;  %v3336_v5 = vor.u32 %v4687_v56, %v3335_v52  ;;  %v3401_v52 = vld [vmem:[#allocation5 + $0x1b8] sm:$0xf0] }
  0x7e   :  { %1550 = vmatpush.bf16.msra.mxu3 %v3416_v60  ;;  %v3815_v60 = vld [vmem:[#allocation5 + $0x4e8] sm:$0xf]  ;;  %v4807_v61 = vld [vmem:[#allocation5 + $0x4f4] sm:$0xf0]  ;;  %v3257_v56 = vld [vmem:[#allocation5 + $0x98] sm:$0xf0] }
  0x7f   :  { %1566 = vmatpush.bf16.msrb.mxu0 %v3512_v18  ;;  %v4715_v2 = vld [vmem:[#allocation5 + $0x214] sm:$0xf0]  ;;  %v3575_v4 = vld [vmem:[#allocation5 + $0x308] sm:$0xf]  ;;  %v3337_v43 = vld [vmem:[#allocation5 + $0x138] sm:$0xf0] }
  0x80   :  { %v4747_v6 = vld [vmem:[#allocation5 + $0x314] sm:$0xf0]  ;;  %v3448_v16 = vor.u32 %v4715_v2, %v3447_v0  ;;  %v3943_v17 = vld [vmem:[#allocation5 + $0x5e8] sm:$0xf]  ;;  %v3385_v0 = vld [vmem:[#allocation5 + $0x198] sm:$0xf0] }
  0x81   :  { %1578 = vmatpush.bf16.msra.mxu2 %v3672_v57  ;;  %1538 = vmatpush.bf16.msrb.mxu1 %v3256_v15  ;;  %v3191_v57 = vld [vmem:[#allocation5 + $0x8] sm:$0xf]  ;;  %v4843_v8 = vld [vmem:[#allocation5 + $0x614] sm:$0xf0]  ;;  %v3816_v15 = vor.u32 %v4807_v61, %v3815_v60  ;;  %v3576_v20 = vor.u32 %v4747_v6, %v3575_v4  ;;  %v3241_v6 = vld [vmem:[#allocation5 + $0x78] sm:$0xf0] }
  0x82   :  { %1551 = vmatpush.bf16.msra.mxu3 %v3400_v12  ;;  %v3192_v9 = vor.u32 %v4651_v59, %v3191_v57  ;;  %v4683_v12 = vld [vmem:[#allocation5 + $0x114] sm:$0xf0]  ;;  %v3799_v19 = vld [vmem:[#allocation5 + $0x4c8] sm:$0xf] }
  0x83   :  { %1567 = vmatpush.bf16.msrb.mxu0 %v3496_v33  ;;  %v4839_v18 = vld [vmem:[#allocation5 + $0x5f4] sm:$0xf0]  ;;  %v3320_v27 = vor.u32 %v4683_v12, %v3319_v63  ;;  %v3927_v35 = vld [vmem:[#allocation5 + $0x5c8] sm:$0xf]  ;;  %v4697_v63 = vld [vmem:[#allocation5 + $0x18c] sm:$0xf] }
  0x84   :  { %v3783_v37 = vld [vmem:[#allocation5 + $0x4a8] sm:$0xf]  ;;  %v4799_v38 = vld [vmem:[#allocation5 + $0x4b4] sm:$0xf0] }
  0x85   :  { %1579 = vmatpush.bf16.msra.mxu2 %v3656_v7  ;;  %1539 = vmatpush.bf16.msrb.mxu1 %v3240_v30  ;;  %v3959_v7 = vld [vmem:[#allocation5 + $0x608] sm:$0xf]  ;;  %v3944_v30 = vor.u32 %v4839_v18, %v3943_v17  ;;  %v4795_v50 = vld [vmem:[#allocation5 + $0x494] sm:$0xf0] }
  0x86   :  { %1552 = vmatpush.bf16.msra.mxu3 %v3384_v26  ;;  %v3960_v22 = vor.u32 %v4843_v8, %v3959_v7  ;;  %v3433_v26 = vld [vmem:[#allocation5 + $0x1f8] sm:$0xf0]  ;;  %v3911_v47 = vld [vmem:[#allocation5 + $0x5a8] sm:$0xf]  ;;  %v4827_v60 = vld [vmem:[#allocation5 + $0x594] sm:$0xf0]  ;;  %v3388_v8 = vor.u32 %v4697_v63, %v3385_v0 }
  0x87   :  { %3966 = vmatmul.msk.bf16.vlgmr.msrb.gmra.mxu3 %vm1335_vm1, %v5244_v29  ;;  %1568 = vmatpush.bf16.msrb.mxu0 %v3480_v45  ;;  %v3436_v34 = vor.u32 %v4709_v23, %v3433_v26  ;;  %v3784_v45 = vor.u32 %v4799_v38, %v3783_v37  ;;  %v3767_v49 = vld [vmem:[#allocation5 + $0x488] sm:$0xf]  ;;  %v4823_v12 = vld [vmem:[#allocation5 + $0x574] sm:$0xf0]  ;;  %v3321_v63 = vld [vmem:[#allocation5 + $0x118] sm:$0xf0] }
  0x88   :  { %v3768_v57 = vor.u32 %v4795_v50, %v3767_v49  ;;  %v3895_v59 = vld [vmem:[#allocation5 + $0x588] sm:$0xf]  ;;  %v4787_v14 = vld [vmem:[#allocation5 + $0x454] sm:$0xf0]  ;;  %v4649_v49 = vld [vmem:[#allocation5 + $0xc] sm:$0xf] }
  0x89   :  { %1580 = vmatpush.bf16.msra.mxu2 %v3640_v21  ;;  %1540 = vmatpush.bf16.msrb.mxu1 %v3224_v42  ;;  %v4803_v21 = vld [vmem:[#allocation5 + $0x4d4] sm:$0xf0]  ;;  %v3751_v61 = vld [vmem:[#allocation5 + $0x468] sm:$0xf]  ;;  %v3896_v4 = vor.u32 %v4827_v60, %v3895_v59  ;;  %v3193_v50 = vld [vmem:[#allocation5 + $0x18] sm:$0xf0] }
  0x8a   :  { %1553 = vmatpush.bf16.msra.mxu3 %v3368_v39  ;;  %v3800_v33 = vor.u32 %v4803_v21, %v3799_v19  ;;  %v4705_v39 = vld [vmem:[#allocation5 + $0x1cc] sm:$0xf]  ;;  %v3735_v13 = vld [vmem:[#allocation5 + $0x448] sm:$0xf]  ;;  %v4819_v26 = vld [vmem:[#allocation5 + $0x554] sm:$0xf0]  ;;  %v3196_v60 = vor.u32 %v4649_v49, %v3193_v50 }
  0x8b   :  { %1569 = vmatpush.bf16.msrb.mxu0 %v3464_v58  ;;  %v3420_v46 = vor.u32 %v4705_v39, %v3417_v40  ;;  %v4657_v19 = vld [vmem:[#allocation5 + $0x4c] sm:$0xf]  ;;  %v3736_v21 = vor.u32 %v4787_v14, %v3735_v13  ;;  %v3863_v23 = vld [vmem:[#allocation5 + $0x548] sm:$0xf]  ;;  %v4815_v39 = vld [vmem:[#allocation5 + $0x534] sm:$0xf0] }
  0x8c   :  { %v3847_v38 = vld [vmem:[#allocation5 + $0x528] sm:$0xf]  ;;  %v4737_v59 = vld [vmem:[#allocation5 + $0x2cc] sm:$0xf]  ;;  %v3801_v14 = vld [vmem:[#allocation5 + $0x4d8] sm:$0xf0] }
  0x8d   :  { %1581 = vmatpush.bf16.msra.mxu2 %v3624_v36  ;;  %1541 = vmatpush.bf16.msrb.mxu1 %v3208_v55  ;;  %v4835_v36 = vld [vmem:[#allocation5 + $0x5d4] sm:$0xf0]  ;;  %v4665_v55 = vld [vmem:[#allocation5 + $0x8c] sm:$0xf]  ;;  %v3703_v40 = vld [vmem:[#allocation5 + $0x408] sm:$0xf] }
  0x8e   :  { %1554 = vmatpush.bf16.msra.mxu3 %v3352_v51  ;;  %v3928_v42 = vor.u32 %v4835_v36, %v3927_v35  ;;  %v4701_v51 = vld [vmem:[#allocation5 + $0x1ac] sm:$0xf]  ;;  %v3260_v2 = vor.u32 %v4665_v55, %v3257_v56  ;;  %v3209_v35 = vld [vmem:[#allocation5 + $0x38] sm:$0xf0] }
  0x8f   :  { %1570 = vmatpush.bf16.msrb.mxu0 %v3448_v16  ;;  %v3404_v58 = vor.u32 %v4701_v51, %v3401_v52  ;;  %v3369_v16 = vld [vmem:[#allocation5 + $0x178] sm:$0xf0]  ;;  %v4801_v13 = vld [vmem:[#allocation5 + $0x4cc] sm:$0xf] }
  0x90   :  { %v3689_v55 = vld [vmem:[#allocation5 + $0x3f8] sm:$0xf0] }
  0x91   :  { %1582 = vmatpush.bf16.msra.mxu2 %v3608_v48  ;;  %1542 = vmatpush.bf16.msrb.mxu1 %v3192_v9  ;;  %v4831_v48 = vld [vmem:[#allocation5 + $0x5b4] sm:$0xf0]  ;;  %v3879_v9 = vld [vmem:[#allocation5 + $0x568] sm:$0xf]  ;;  %v3625_v50 = vld [vmem:[#allocation5 + $0x378] sm:$0xf0] }
  0x92   :  { %1555 = vmatpush.bf16.msra.mxu3 %v3336_v5  ;;  %1571 = vmatmul.bf16.vlgmr.msrb.gmra.mxu0 %v5212_v10  ;;  %v3912_v54 = vor.u32 %v4831_v48, %v3911_v47  ;;  %v4661_v5 = vld [vmem:[#allocation5 + $0x6c] sm:$0xf]  ;;  %v3880_v18 = vor.u32 %v4823_v12, %v3879_v9  ;;  %v3848_v47 = vor.u32 %v4815_v39, %v3847_v38  ;;  %v3831_v48 = vld [vmem:[#allocation5 + $0x508] sm:$0xf]  ;;  %v3673_v12 = vld [vmem:[#allocation5 + $0x3d8] sm:$0xf0] }
  0x93   :  { %1626 = vmatpush.bf16.msra.mxu0 %v3960_v22  ;;  %v3244_v17 = vor.u32 %v4661_v5, %v3241_v6  ;;  %v3641_v39 = vld [vmem:[#allocation5 + $0x398] sm:$0xf0] }
  0x94   :  { %1543 = vmatmul.bf16.vlgmr.msrb.gmra.mxu1 %v5221_v24 }
  0x95   :  { %1583 = vmatpush.bf16.msra.mxu2 %v3592_v62  ;;  %1591 = vmatpush.bf16.msra.mxu1 %v3816_v15  ;;  %v4791_v62 = vld [vmem:[#allocation5 + $0x474] sm:$0xf0]  ;;  %v4693_v15 = vld [vmem:[#allocation5 + $0x16c] sm:$0xf] }
  0x96   :  { %1556 = vmatpush.bf16.msra.mxu3 %v3320_v27  ;;  %v3752_v7 = vor.u32 %v4791_v62, %v3751_v61  ;;  %v3372_v22 = vor.u32 %v4693_v15, %v3369_v16  ;;  %v3719_v27 = vld [vmem:[#allocation5 + $0x428] sm:$0xf]  ;;  %v3545_v61 = vld [vmem:[#allocation5 + $0x2d8] sm:$0xf0]  ;;  %v4681_v62 = vld [vmem:[#allocation5 + $0x10c] sm:$0xf] }
  0x97   :  { %1647 = vmatpush.bf16.msrb.mxu0 %v3436_v34  ;;  %v4653_v34 = vld [vmem:[#allocation5 + $0x2c] sm:$0xf]  ;;  %v3324_v9 = vor.u32 %v4681_v62, %v3321_v63  ;;  %v3737_v63 = vld [vmem:[#allocation5 + $0x458] sm:$0xf0] }
  0x98   :  { %v3212_v44 = vor.u32 %v4653_v34, %v3209_v35  ;;  %v4733_v16 = vld [vmem:[#allocation5 + $0x2ac] sm:$0xf]  ;;  %v3913_v34 = vld [vmem:[#allocation5 + $0x5b8] sm:$0xf0] }
  0x99   :  { %1584 = vmatpush.bf16.msra.mxu2 %v3576_v20  ;;  %1592 = vmatpush.bf16.msra.mxu1 %v3800_v33  ;;  %v3225_v20 = vld [vmem:[#allocation5 + $0x58] sm:$0xf0]  ;;  %v3864_v33 = vor.u32 %v4819_v26, %v3863_v23  ;;  %v4785_v62 = vld [vmem:[#allocation5 + $0x44c] sm:$0xf] }
  0x9a   :  { %1605 = vmatpush.bf16.msrb.mxu3 %v3944_v30  ;;  %v4689_v30 = vld [vmem:[#allocation5 + $0x14c] sm:$0xf]  ;;  %v3228_v32 = vor.u32 %v4657_v19, %v3225_v20  ;;  %v3929_v19 = vld [vmem:[#allocation5 + $0x5d8] sm:$0xf0] }
  0x9b   :  { %1557 = vmatmul.bf16.vlgmr.msra.gmra.mxu3 %v5223_v25  ;;  %1648 = vmatpush.bf16.msrb.mxu0 %v3420_v46  ;;  %v3356_v37 = vor.u32 %v4689_v30, %v3353_v31  ;;  %v3561_v46 = vld [vmem:[#allocation5 + $0x2f8] sm:$0xf0]  ;;  %v4729_v31 = vld [vmem:[#allocation5 + $0x28c] sm:$0xf] }
  0x9c   :  { %1585 = vmatmul.bf16.vlgmr.msra.gmra.mxu2 %v5214_v11  ;;  %v3657_v26 = vld [vmem:[#allocation5 + $0x3b8] sm:$0xf0] }
  0x9d   :  { %1633 = vmatpush.bf16.msrb.mxu2 %v3308_v28  ;;  %1593 = vmatpush.bf16.msra.mxu1 %v3784_v45  ;;  %v4783_v28 = vld [vmem:[#allocation5 + $0x434] sm:$0xf0]  ;;  %v4741_v45 = vld [vmem:[#allocation5 + $0x2ec] sm:$0xf] }
  0x9e   :  { %1606 = vmatpush.bf16.msrb.mxu3 %v3928_v42  ;;  %v3720_v36 = vor.u32 %v4783_v28, %v3719_v27  ;;  %v4685_v42 = vld [vmem:[#allocation5 + $0x12c] sm:$0xf]  ;;  %v3564_v56 = vor.u32 %v4741_v45, %v3561_v46  ;;  %v3785_v28 = vld [vmem:[#allocation5 + $0x4b8] sm:$0xf0] }
  0x9f   :  { %1649 = vmatpush.bf16.msrb.mxu0 %v3404_v58  ;;  %v3340_v52 = vor.u32 %v4685_v42, %v3337_v43  ;;  %v3817_v58 = vld [vmem:[#allocation5 + $0x4f8] sm:$0xf0]  ;;  %v4797_v27 = vld [vmem:[#allocation5 + $0x4ac] sm:$0xf] }
  0xa0   :  { %v4725_v43 = vld [vmem:[#allocation5 + $0x26c] sm:$0xf] }
  0xa1   :  { %1634 = vmatpush.bf16.msrb.mxu2 %v3292_v41  ;;  %1594 = vmatpush.bf16.msra.mxu1 %v3768_v57  ;;  %v4779_v41 = vld [vmem:[#allocation5 + $0x414] sm:$0xf0]  ;;  %v4805_v57 = vld [vmem:[#allocation5 + $0x4ec] sm:$0xf] }
  0xa2   :  { %1607 = vmatpush.bf16.msrb.mxu3 %v3912_v54  ;;  %3967 = vmatmul.msk.bf16.vlgmr.msra.gmra.mxu0 %vm1335_vm1, %v5244_v29  ;;  %v3704_v51 = vor.u32 %v4779_v41, %v3703_v40  ;;  %v4773_v54 = vld [vmem:[#allocation5 + $0x3ec] sm:$0xf]  ;;  %v3820_v6 = vor.u32 %v4805_v57, %v3817_v58  ;;  %v3769_v41 = vld [vmem:[#allocation5 + $0x498] sm:$0xf0] }
  0xa3   :  { %1650 = vmatpush.bf16.msrb.mxu0 %v3388_v8  ;;  %v3692_v5 = vor.u32 %v4773_v54, %v3689_v55  ;;  %v3548_v8 = vor.u32 %v4737_v59, %v3545_v61  ;;  %v4793_v40 = vld [vmem:[#allocation5 + $0x48c] sm:$0xf]  ;;  %v3609_v61 = vld [vmem:[#allocation5 + $0x358] sm:$0xf0] }
  0xa4   :  { %v4825_v45 = vld [vmem:[#allocation5 + $0x58c] sm:$0xf] }
  0xa5   :  { %1635 = vmatpush.bf16.msrb.mxu2 %v3276_v53  ;;  %1595 = vmatpush.bf16.msra.mxu1 %v3752_v7  ;;  %v4811_v53 = vld [vmem:[#allocation5 + $0x514] sm:$0xf0]  ;;  %v4769_v7 = vld [vmem:[#allocation5 + $0x3cc] sm:$0xf] }
  0xa6   :  { %1608 = vmatpush.bf16.msrb.mxu3 %v3896_v4  ;;  %v3832_v0 = vor.u32 %v4811_v53, %v3831_v48  ;;  %v3945_v4 = vld [vmem:[#allocation5 + $0x5f8] sm:$0xf0]  ;;  %v3676_v20 = vor.u32 %v4769_v7, %v3673_v12  ;;  %v4757_v48 = vld [vmem:[#allocation5 + $0x36c] sm:$0xf] }
  0xa7   :  { %1651 = vmatpush.bf16.msrb.mxu0 %v3372_v22  ;;  %v4765_v22 = vld [vmem:[#allocation5 + $0x3ac] sm:$0xf]  ;;  %v3628_v57 = vor.u32 %v4757_v48, %v3625_v50  ;;  %v4211_v48 = vld [vmem:[#allocation8 + $0x1c0] sm:$0xf] }
  0xa8   :  { %v3660_v35 = vor.u32 %v4765_v22, %v3657_v26  ;;  %v4721_v54 = vld [vmem:[#allocation5 + $0x24c] sm:$0xf]  ;;  %v3961_v22 = vld [vmem:[#allocation5 + $0x618] sm:$0xf0] }
  0xa9   :  { %1636 = vmatpush.bf16.msrb.mxu2 %v3260_v2  ;;  %1596 = vmatpush.bf16.msra.mxu1 %v3736_v21  ;;  %v4837_v2 = vld [vmem:[#allocation5 + $0x5ec] sm:$0xf]  ;;  %v3804_v21 = vor.u32 %v4801_v13, %v3801_v14  ;;  %v3593_v13 = vld [vmem:[#allocation5 + $0x338] sm:$0xf0] }
  0xaa   :  { %1609 = vmatpush.bf16.msrb.mxu3 %v3880_v18  ;;  %v3948_v15 = vor.u32 %v4837_v2, %v3945_v4  ;;  %v4833_v18 = vld [vmem:[#allocation5 + $0x5cc] sm:$0xf]  ;;  %v3465_v4 = vld [vmem:[#allocation5 + $0x238] sm:$0xf0] }
  0xab   :  { %1652 = vmatpush.bf16.msrb.mxu0 %v3356_v37  ;;  %v3932_v30 = vor.u32 %v4833_v18, %v3929_v19  ;;  %v4761_v37 = vld [vmem:[#allocation5 + $0x38c] sm:$0xf]  ;;  %v3449_v18 = vld [vmem:[#allocation5 + $0x218] sm:$0xf0] }
  0xac   :  { %v3644_v46 = vor.u32 %v4761_v37, %v3641_v39  ;;  %v4821_v55 = vld [vmem:[#allocation5 + $0x56c] sm:$0xf]  ;;  %v4878_v37 = vld [vmem:[#allocation8 + $0xec] sm:$0xf0]  ;;  %v4227_v39 = vld [vmem:[#allocation8 + $0x1e0] sm:$0xf] }
  0xad   :  { %1637 = vmatpush.bf16.msrb.mxu2 %v3244_v17  ;;  %1597 = vmatpush.bf16.msra.mxu1 %v3720_v36  ;;  %v3529_v17 = vld [vmem:[#allocation5 + $0x2b8] sm:$0xf0]  ;;  %v3788_v36 = vor.u32 %v4797_v27, %v3785_v28  ;;  %v4753_v59 = vld [vmem:[#allocation5 + $0x34c] sm:$0xf] }
  0xae   :  { %1610 = vmatpush.bf16.msrb.mxu3 %v3864_v33  ;;  %v3532_v23 = vor.u32 %v4733_v16, %v3529_v17  ;;  %v4829_v33 = vld [vmem:[#allocation5 + $0x5ac] sm:$0xf]  ;;  %v3612_v7 = vor.u32 %v4753_v59, %v3609_v61  ;;  %v4179_v59 = vld [vmem:[#allocation8 + $0x180] sm:$0xf] }
  0xaf   :  { %1653 = vmatpush.bf16.msrb.mxu0 %v3340_v52  ;;  %v3916_v42 = vor.u32 %v4829_v33, %v3913_v34  ;;  %v3753_v52 = vld [vmem:[#allocation5 + $0x478] sm:$0xf0]  ;;  %v4717_v2 = vld [vmem:[#allocation5 + $0x22c] sm:$0xf] }
  0xb0   :  { %v3468_v12 = vor.u32 %v4717_v2, %v3465_v4  ;;  %v4781_v14 = vld [vmem:[#allocation5 + $0x42c] sm:$0xf]  ;;  %v4894_v2 = vld [vmem:[#allocation8 + $0x16c] sm:$0xf0] }
  0xb1   :  { %1638 = vmatpush.bf16.msrb.mxu2 %v3228_v32  ;;  %1598 = vmatpush.bf16.msra.mxu1 %v3704_v51  ;;  %v3513_v32 = vld [vmem:[#allocation5 + $0x298] sm:$0xf0]  ;;  %v4789_v51 = vld [vmem:[#allocation5 + $0x46c] sm:$0xf] }
  0xb2   :  { %1611 = vmatpush.bf16.msrb.mxu3 %v3848_v47  ;;  %v3516_v38 = vor.u32 %v4729_v31, %v3513_v32  ;;  %v3772_v47 = vor.u32 %v4793_v40, %v3769_v41  ;;  %v3756_v58 = vor.u32 %v4789_v51, %v3753_v52  ;;  %v4713_v17 = vld [vmem:[#allocation5 + $0x20c] sm:$0xf]  ;;  %v3705_v32 = vld [vmem:[#allocation5 + $0x418] sm:$0xf0]  ;;  %v4910_v40 = vld [vmem:[#allocation8 + $0x1ec] sm:$0xf0] }
  0xb3   :  { %1654 = vmatpush.bf16.msrb.mxu0 %v3324_v9  ;;  %v4749_v9 = vld [vmem:[#allocation5 + $0x32c] sm:$0xf]  ;;  %v3452_v28 = vor.u32 %v4713_v17, %v3449_v18  ;;  %v4067_v52 = vld [vmem:[#allocation8 + $0xa0] sm:$0xf] }
  0xb4   :  { %1599 = vmatmul.bf16.vlgmr.msra.gmra.mxu1 %v5248_v1  ;;  %v4813_v19 = vld [vmem:[#allocation5 + $0x52c] sm:$0xf]  ;;  %v4003_v18 = vld [vmem:[#allocation8 + $0x20] sm:$0xf] }
  0xb5   :  { %1639 = vmatpush.bf16.msrb.mxu2 %v3212_v44  ;;  %1661 = vmatpush.bf16.msrb.mxu1 %v3564_v56  ;;  %v3497_v44 = vld [vmem:[#allocation5 + $0x278] sm:$0xf0]  ;;  %v4745_v27 = vld [vmem:[#allocation5 + $0x30c] sm:$0xf] }
  0xb6   :  { %1612 = vmatpush.bf16.msrb.mxu3 %v3832_v0  ;;  %1655 = vmatmul.bf16.vlgmr.msrb.gmra.mxu0 %v5223_v25  ;;  %v3500_v49 = vor.u32 %v4725_v43, %v3497_v44  ;;  %v3481_v25 = vld [vmem:[#allocation5 + $0x258] sm:$0xf0]  ;;  %v4777_v31 = vld [vmem:[#allocation5 + $0x40c] sm:$0xf] }
  0xb7   :  { %1703 = vmatpush.bf16.msra.mxu0 %v3948_v15  ;;  %v3881_v56 = vld [vmem:[#allocation5 + $0x578] sm:$0xf0]  ;;  %v4809_v34 = vld [vmem:[#allocation5 + $0x50c] sm:$0xf] }
  0xb8   :  { %v3884_v0 = vor.u32 %v4821_v55, %v3881_v56  ;;  %v3721_v15 = vld [vmem:[#allocation5 + $0x438] sm:$0xf0]  ;;  %v4051_v56 = vld [vmem:[#allocation8 + $0x80] sm:$0xf] }
  0xb9   :  { %1640 = vmatpush.bf16.msrb.mxu2 %v3196_v60  ;;  %1662 = vmatpush.bf16.msrb.mxu1 %v3548_v8  ;;  %v3484_v60 = vor.u32 %v4721_v54, %v3481_v25  ;;  %v3740_v8 = vor.u32 %v4785_v62, %v3737_v63  ;;  %v3724_v26 = vor.u32 %v4781_v14, %v3721_v15  ;;  %v4195_v54 = vld [vmem:[#allocation8 + $0x1a0] sm:$0xf]  ;;  %v4902_v25 = vld [vmem:[#allocation8 + $0x1ac] sm:$0xf0] }
  0xba   :  { %1675 = vmatpush.bf16.msra.mxu3 %v3692_v5  ;;  %v4817_v5 = vld [vmem:[#allocation5 + $0x54c] sm:$0xf]  ;;  %v4035_v63 = vld [vmem:[#allocation8 + $0x60] sm:$0xf] }
  0xbb   :  { %1613 = vmatmul.bf16.vlgmr.msrb.gmra.mxu3 %v5250_v3  ;;  %1704 = vmatpush.bf16.msra.mxu0 %v3932_v30  ;;  %v3577_v30 = vld [vmem:[#allocation5 + $0x318] sm:$0xf0] }
  0xbc   :  { %1641 = vmatmul.bf16.vlgmr.msrb.gmra.mxu2 %v5221_v24  ;;  %v3897_v24 = vld [vmem:[#allocation5 + $0x598] sm:$0xf0]  ;;  %v3580_v41 = vor.u32 %v4745_v27, %v3577_v30  ;;  %v3987_v27 = vld [vmem:[#allocation8] sm:$0xf]  ;;  %v4882_v30 = vld [vmem:[#allocation8 + $0x10c] sm:$0xf0] }
  0xbd   :  { %1689 = vmatpush.bf16.msra.mxu2 %v3820_v6  ;;  %1663 = vmatpush.bf16.msrb.mxu1 %v3532_v23  ;;  %v3900_v53 = vor.u32 %v4825_v45, %v3897_v24  ;;  %v3865_v6 = vld [vmem:[#allocation5 + $0x558] sm:$0xf0]  ;;  %v3596_v23 = vor.u32 %v4749_v9, %v3593_v13  ;;  %v4228_v24 = vor.u32 %v4910_v40, %v4227_v39  ;;  %v5284_v4 = vpop.f32.mrf.mxu1  ;;  %v4147_v9 = vld [vmem:[#allocation8 + $0x140] sm:$0xf] }
  0xbe   :  { %1676 = vmatpush.bf16.msra.mxu3 %v3676_v20  ;;  %v3868_v16 = vor.u32 %v4817_v5, %v3865_v6  ;;  %v3849_v20 = vld [vmem:[#allocation5 + $0x538] sm:$0xf0] }
  0xbf   :  { %1705 = vmatpush.bf16.msra.mxu0 %v3916_v42  ;;  %v3852_v33 = vor.u32 %v4813_v19, %v3849_v20  ;;  %v3708_v42 = vor.u32 %v4777_v31, %v3705_v32  ;;  %v5272_v44 = vpop.f32.mrf.mxu2  ;;  %v5280_v61 = vpop.f32.mrf.mxu3  ;;  %v4854_v19 = vld [vmem:[#allocation8 + $0x2c] sm:$0xf0]  ;;  %v4131_v20 = vld [vmem:[#allocation8 + $0x120] sm:$0xf]  ;;  %v4876_v31 = vld [vmem:[#allocation8 + $0xe4] sm:$0xf] }
  0xc0   :  { %v4101_v32 = vld [vmem:[#allocation8 + $0xf0] sm:$0xf0] }
  0xc1   :  { %1690 = vmatpush.bf16.msra.mxu2 %v3804_v21  ;;  %1664 = vmatpush.bf16.msrb.mxu1 %v3516_v38  ;;  %v4841_v21 = vld [vmem:[#allocation5 + $0x60c] sm:$0xf]  ;;  %v3833_v38 = vld [vmem:[#allocation5 + $0x518] sm:$0xf0]  ;;  %v4104_v40 = vor.u32 %v4876_v31, %v4101_v32  ;;  %v4852_v32 = vld [vmem:[#allocation8 + $0x24] sm:$0xf] }
  0xc2   :  { %1677 = vmatpush.bf16.msra.mxu3 %v3660_v35  ;;  %v3964_v35 = vor.u32 %v4841_v21, %v3961_v22  ;;  %v3836_v45 = vor.u32 %v4809_v34, %v3833_v38  ;;  %v4886_v21 = vld [vmem:[#allocation8 + $0x12c] sm:$0xf0]  ;;  %v4004_v22 = vor.u32 %v4854_v19, %v4003_v18  ;;  %v4229_v34 = vld [vmem:[#allocation8 + $0x1f0] sm:$0xf0] }
  0xc3   :  { %1706 = vmatpush.bf16.msra.mxu0 %v3900_v53  ;;  %v4870_v53 = vld [vmem:[#allocation8 + $0xac] sm:$0xf0]  ;;  %v4021_v19 = vld [vmem:[#allocation8 + $0x50] sm:$0xf0] }
  0xc4   :  { %v4068_v55 = vor.u32 %v4870_v53, %v4067_v52  ;;  %v4900_v52 = vld [vmem:[#allocation8 + $0x1a4] sm:$0xf]  ;;  %v4197_v53 = vld [vmem:[#allocation8 + $0x1b0] sm:$0xf0] }
  0xc5   :  { %1691 = vmatpush.bf16.msra.mxu2 %v3788_v36  ;;  %1665 = vmatpush.bf16.msrb.mxu1 %v3500_v49  ;;  %v4099_v36 = vld [vmem:[#allocation8 + $0xe0] sm:$0xf]  ;;  %v4906_v49 = vld [vmem:[#allocation8 + $0x1cc] sm:$0xf0] }
  0xc6   :  { %1678 = vmatpush.bf16.msra.mxu3 %v3644_v46  ;;  %v4100_v43 = vor.u32 %v4878_v37, %v4099_v36  ;;  %v4083_v46 = vld [vmem:[#allocation8 + $0xc0] sm:$0xf]  ;;  %v4212_v51 = vor.u32 %v4906_v49, %v4211_v48 }
  0xc7   :  { %1707 = vmatpush.bf16.msra.mxu0 %v3884_v0  ;;  %v5282_v62 = vpop.f32.mrf.mxu2  ;;  %v4163_v0 = vld [vmem:[#allocation8 + $0x160] sm:$0xf] }
  0xc8   :  { %v4164_v6 = vor.u32 %v4894_v2, %v4163_v0 }
  0xc9   :  { %1692 = vmatpush.bf16.msra.mxu2 %v3772_v47  ;;  %1666 = vmatpush.bf16.msrb.mxu1 %v3484_v60  ;;  %v4874_v47 = vld [vmem:[#allocation8 + $0xcc] sm:$0xf0] }
  0xca   :  { %1679 = vmatpush.bf16.msra.mxu3 %v3628_v57  ;;  %v4084_v50 = vor.u32 %v4874_v47, %v4083_v46  ;;  %v4866_v57 = vld [vmem:[#allocation8 + $0x8c] sm:$0xf0]  ;;  %v5303_v46 = vld [vmem:[%s5426_s2] sm:$0xf] }
  0xcb   :  { %1708 = vmatpush.bf16.msra.mxu0 %v3868_v16  ;;  %v4898_v60 = vld [vmem:[#allocation8 + $0x18c] sm:$0xf0]  ;;  %v5292_v16 = vpop.f32.mrf.mxu3  ;;  %v313_v0 = vperm.slane %v5303_v46, 1 }
  0xcd   :  { %1693 = vmatpush.bf16.msra.mxu2 %v3756_v58  ;;  %1667 = vmatpush.bf16.msrb.mxu1 %v3468_v12  ;;  %v5278_v58 = vpop.f32.mrf.mxu0  ;;  %v4890_v12 = vld [vmem:[#allocation8 + $0x14c] sm:$0xf0] }
  0xce   :  { %1680 = vmatpush.bf16.msra.mxu3 %v3612_v7  ;;  %v4019_v7 = vld [vmem:[#allocation8 + $0x40] sm:$0xf]  ;;  %v4148_v17 = vor.u32 %v4890_v12, %v4147_v9  ;;  %v4165_v9 = vld [vmem:[#allocation8 + $0x170] sm:$0xf0] }
  0xcf   :  { %1709 = vmatpush.bf16.msra.mxu0 %v3852_v33  ;;  %v5286_v13 = vpop.f32.mrf.mxu2  ;;  %v4908_v33 = vld [vmem:[#allocation8 + $0x1e4] sm:$0xf] }
  0xd1   :  { %1694 = vmatpush.bf16.msra.mxu2 %v3740_v8  ;;  %1668 = vmatpush.bf16.msrb.mxu1 %v3452_v28  ;;  %v4858_v8 = vld [vmem:[#allocation8 + $0x4c] sm:$0xf0]  ;;  %v4115_v28 = vld [vmem:[#allocation8 + $0x100] sm:$0xf] }
  0xd2   :  { %1681 = vmatpush.bf16.msra.mxu3 %v3596_v23  ;;  %v4020_v15 = vor.u32 %v4858_v8, %v4019_v7  ;;  %v5294_v23 = vpop.f32.mrf.mxu1  ;;  %v4116_v39 = vor.u32 %v4882_v30, %v4115_v28  ;;  %v4892_v8 = vld [vmem:[#allocation8 + $0x164] sm:$0xf] }
  0xd3   :  { %1710 = vmatpush.bf16.msra.mxu0 %v3836_v45  ;;  %v4904_v45 = vld [vmem:[#allocation8 + $0x1c4] sm:$0xf]  ;;  %v4168_v18 = vor.u32 %v4892_v8, %v4165_v9 }
  0xd4   :  { %1669 = vmatmul.bf16.vlgmr.msrb.gmra.mxu1 %v5212_v10  ;;  %v4196_v10 = vor.u32 %v4902_v25, %v4195_v54  ;;  %v312_v54 = vperm.slane %v5303_v46, 0 }
  0xd5   :  { %1695 = vmatpush.bf16.msra.mxu2 %v3724_v26  ;;  %1724 = vmatpush.bf16.msra.mxu1 %v3964_v35  ;;  %v5290_v14 = vpop.f32.mrf.mxu0  ;;  %v4132_v26 = vor.u32 %v4886_v21, %v4131_v20 }
  0xd6   :  { %1682 = vmatpush.bf16.msra.mxu3 %v3580_v41  ;;  %1711 = vmatmul.bf16.vlgmr.msra.gmra.mxu0 %v5250_v3  ;;  %v4862_v3 = vld [vmem:[#allocation8 + $0x6c] sm:$0xf0]  ;;  %v4232_v41 = vor.u32 %v4908_v33, %v4229_v34  ;;  %v4005_v33 = vld [vmem:[#allocation8 + $0x30] sm:$0xf0] }
  0xd7   :  { %v4036_v5 = vor.u32 %v4862_v3, %v4035_v63  ;;  %v5298_v37 = vpop.f32.mrf.mxu2  ;;  %v1349_v63 = vadd.f32 %v5278_v58, %v312_v54  ;;  %v4856_v58 = vld [vmem:[#allocation8 + $0x44] sm:$0xf] }
  0xd8   :  { %v4024_v30 = vor.u32 %v4856_v58, %v4021_v19  ;;  %v4942_v58 = vld [vmem:[#allocation8 + $0x2ec] sm:$0xf0]  ;;  %v4483_v19 = vld [vmem:[#allocation8 + $0x3e0] sm:$0xf] }
  0xd9   :  { %1696 = vmatpush.bf16.msra.mxu2 %v3708_v42  ;;  %2563 = vmatpush.bf16.msrb.mxu1 %v4228_v24  ;;  %v4872_v42 = vld [vmem:[#allocation8 + $0xc4] sm:$0xf]  ;;  %v4213_v24 = vld [vmem:[#allocation8 + $0x1d0] sm:$0xf0]  ;;  %v1363_v12 = vadd.f32 %v5284_v4, %v1349_v63 }
  0xda   :  { %2549 = vmatpush.bf16.msrb.mxu3 %v4100_v43  ;;  %v1446_v38 = vpop.f32.mrf.mxu3  ;;  %v4085_v43 = vld [vmem:[#allocation8 + $0xd0] sm:$0xf0]  ;;  %v5305_v47 = vpop.f32.mrf.mxu1  ;;  %v4216_v49 = vor.u32 %v4904_v45, %v4213_v24  ;;  %v4848_v45 = vld [vmem:[#allocation8 + $0x4] sm:$0xf] }
  0xdb   :  { %1683 = vmatmul.bf16.vlgmr.msra.gmra.mxu3 %v5214_v11  ;;  %v4052_v11 = vor.u32 %v4866_v57, %v4051_v56  ;;  %v4088_v48 = vor.u32 %v4872_v42, %v4085_v43  ;;  %v4864_v56 = vld [vmem:[#allocation8 + $0x84] sm:$0xf]  ;;  %v4053_v57 = vld [vmem:[#allocation8 + $0x90] sm:$0xf0] }
  0xdc   :  { %1697 = vmatmul.bf16.vlgmr.msra.gmra.mxu2 %v5248_v1  ;;  %v4180_v1 = vor.u32 %v4898_v60, %v4179_v59  ;;  %v4056_v3 = vor.u32 %v4864_v56, %v4053_v57  ;;  %v3989_v24 = vld [vmem:[#allocation8 + $0x10] sm:$0xf0] }
  0xdd   :  { %2564 = vmatpush.bf16.msrb.mxu1 %v4212_v51  ;;  %v5296_v35 = vpop.f32.mrf.mxu0  ;;  %v4069_v51 = vld [vmem:[#allocation8 + $0xb0] sm:$0xf0] }
  0xde   :  { %2550 = vmatpush.bf16.msrb.mxu3 %v4084_v50  ;;  %v4868_v50 = vld [vmem:[#allocation8 + $0xa4] sm:$0xf] }
  0xdf   :  { %v4072_v25 = vor.u32 %v4868_v50, %v4069_v51  ;;  %v1460_v59 = vpop.f32.mrf.mxu2  ;;  %v4117_v50 = vld [vmem:[#allocation8 + $0x110] sm:$0xf0] }
  0xe1   :  { %2565 = vmatpush.bf16.msrb.mxu1 %v4196_v10  ;;  %v4200_v10 = vor.u32 %v4900_v52, %v4197_v53 }
  0xe2   :  { %2551 = vmatpush.bf16.msrb.mxu3 %v4068_v55  ;;  %v1448_v60 = vpop.f32.mrf.mxu3  ;;  %v5312_v7 = vpop.f32.mrf.mxu1 }
  0xe3   :  { %v1449_v42 = vadd.f32 %v1448_v60, %v313_v0 }
  0xe4   :  { %3968 = vmatmul.msk.bf16.vlgmr.msra.gmra.mxu1 %vm1335_vm1, %v5244_v29  ;;  %v4850_v29 = vld [vmem:[#allocation8 + $0xc] sm:$0xf0] }
  0xe5   :  { %2566 = vmatpush.bf16.msrb.mxu1 %v4180_v1  ;;  %v3988_v36 = vor.u32 %v4850_v29, %v3987_v27  ;;  %v5308_v55 = vpop.f32.mrf.mxu0  ;;  %v4181_v1 = vld [vmem:[#allocation8 + $0x190] sm:$0xf0]  ;;  %v1377_v27 = vadd.f32 %v5272_v44, %v1363_v12  ;;  %v1351_v29 = vadd.f32 %v5290_v14, %v312_v54  ;;  %v4008_v44 = vor.u32 %v4852_v32, %v4005_v33  ;;  %v4970_v32 = vld [vmem:[#allocation8 + $0x3cc] sm:$0xf0] }
  0xe6   :  { %2552 = vmatpush.bf16.msrb.mxu3 %v4052_v11  ;;  %v4896_v11 = vld [vmem:[#allocation8 + $0x184] sm:$0xf] }
  0xe7   :  { %v4184_v2 = vor.u32 %v4896_v11, %v4181_v1  ;;  %v1462_v28 = vpop.f32.mrf.mxu2 }
  0xe9   :  { %2567 = vmatpush.bf16.msrb.mxu1 %v4164_v6  ;;  %v4037_v6 = vld [vmem:[#allocation8 + $0x70] sm:$0xf0] }
  0xea   :  { %2553 = vmatpush.bf16.msrb.mxu3 %v4036_v5  ;;  %v4860_v5 = vld [vmem:[#allocation8 + $0x64] sm:$0xf] }
  0xed   :  { %2568 = vmatpush.bf16.msrb.mxu1 %v4148_v17  ;;  %v1447_v17 = vadd.f32 %v1446_v38, %v313_v0  ;;  %v4133_v38 = vld [vmem:[#allocation8 + $0x130] sm:$0xf0] }
  0xee   :  { %2554 = vmatpush.bf16.msrb.mxu3 %v4020_v15  ;;  %v4040_v15 = vor.u32 %v4860_v5, %v4037_v6 }
  0xef   :  { %v1474_v20 = vpop.f32.mrf.mxu0  ;;  %v1461_v31 = vadd.f32 %v1460_v59, %v1447_v17 }
  0xf1   :  { %2569 = vmatpush.bf16.msrb.mxu1 %v4132_v26  ;;  %v4149_v26 = vld [vmem:[#allocation8 + $0x150] sm:$0xf0]  ;;  %v1488_v34 = vpop.f32.mrf.mxu1 }
  0xf2   :  { %2555 = vmatpush.bf16.msrb.mxu3 %v4004_v22  ;;  %v4888_v22 = vld [vmem:[#allocation8 + $0x144] sm:$0xf] }
  0xf3   :  { %v4152_v4 = vor.u32 %v4888_v22, %v4149_v26  ;;  %v4879_v22 = vld [vmem:[#allocation8 + $0xf4] sm:$0xf0] }
  0xf5   :  { %2570 = vmatpush.bf16.msrb.mxu1 %v4116_v39  ;;  %v1391_v39 = vadd.f32 %v5280_v61, %v1377_v27 }
  0xf6   :  { %2556 = vmatpush.bf16.msrb.mxu3 %v3988_v36  ;;  %v4884_v36 = vld [vmem:[#allocation8 + $0x124] sm:$0xf] }
  0xf7   :  { %v1405_v14 = vadd.f32 %v5296_v35, %v1391_v39  ;;  %v4136_v43 = vor.u32 %v4884_v36, %v4133_v38  ;;  %v1476_v53 = vpop.f32.mrf.mxu0  ;;  %v4091_v38 = vld [vmem:[#allocation8 + $0xc8] sm:$0xf]  ;;  %v4875_v39 = vld [vmem:[#allocation8 + $0xd4] sm:$0xf0] }
  0xf9   :  { %2619 = vmatpush.bf16.msra.mxu1 %v4232_v41  ;;  %v1475_v41 = vadd.f32 %v1474_v20, %v1461_v31  ;;  %v1419_v54 = vadd.f32 %v5305_v47, %v1405_v14  ;;  %v1490_v59 = vpop.f32.mrf.mxu1  ;;  %v4911_v31 = vld [vmem:[#allocation8 + $0x1f4] sm:$0xf0] }
  0xfa   :  { %2605 = vmatpush.bf16.msra.mxu3 %v4104_v40  ;;  %v1502_v21 = vpop.f32.mrf.mxu3  ;;  %v1365_v40 = vadd.f32 %v5294_v23, %v1351_v29  ;;  %v3992_v23 = vor.u32 %v4848_v45, %v3989_v24  ;;  %v4938_v29 = vld [vmem:[#allocation8 + $0x2cc] sm:$0xf0]  ;;  %v4323_v45 = vld [vmem:[#allocation8 + $0x2a0] sm:$0xf] }
  0xfb   :  { %v1489_v52 = vadd.f32 %v1488_v34, %v1475_v41  ;;  %v1433_v60 = vadd.f32 %v5286_v13, %v1419_v54  ;;  %v4907_v41 = vld [vmem:[#allocation8 + $0x1d4] sm:$0xf0]  ;;  %v4092_v54 = vor.u32 %v4875_v39, %v4091_v38  ;;  %v4387_v38 = vld [vmem:[#allocation8 + $0x320] sm:$0xf] }
  0xfc   :  { %v1379_v51 = vadd.f32 %v5282_v62, %v1365_v40  ;;  %v4219_v40 = vld [vmem:[#allocation8 + $0x1c8] sm:$0xf] }
  0xfd   :  { %2620 = vmatpush.bf16.msra.mxu1 %v4216_v49  ;;  %v4880_v49 = vld [vmem:[#allocation8 + $0x104] sm:$0xf]  ;;  %v1731_v0 = vmax.f32 %v1433_v60, 0.0  ;;  %v4435_v60 = vld [vmem:[#allocation8 + $0x380] sm:$0xf] }
  0xfe   :  { %2606 = vmatpush.bf16.msra.mxu3 %v4088_v48  ;;  %v4120_v35 = vor.u32 %v4880_v49, %v4117_v50  ;;  %v1393_v56 = vadd.f32 %v5292_v16, %v1379_v51  ;;  %v4934_v49 = vld [vmem:[#allocation8 + $0x2ac] sm:$0xf0]  ;;  %v4451_v50 = vld [vmem:[#allocation8 + $0x3a0] sm:$0xf] }
  0xff   :  { %v1516_v61 = vpop.f32.mrf.mxu2  ;;  %v4966_v51 = vld [vmem:[#allocation8 + $0x3ac] sm:$0xf0] }
 0x100   :  { %v1407_v62 = vadd.f32 %v5308_v55, %v1393_v56  ;;  %v4930_v56 = vld [vmem:[#allocation8 + $0x28c] sm:$0xf0] }
 0x101   :  { %2621 = vmatpush.bf16.msra.mxu1 %v4200_v10  ;;  %v1503_v10 = vadd.f32 %v1502_v21, %v1489_v52  ;;  %v4974_v21 = vld [vmem:[#allocation8 + $0x3ec] sm:$0xf0]  ;;  %v4324_v52 = vor.u32 %v4934_v49, %v4323_v45  ;;  %v4011_v45 = vld [vmem:[#allocation8 + $0x28] sm:$0xf]  ;;  %v4855_v49 = vld [vmem:[#allocation8 + $0x34] sm:$0xf0] }
 0x102   :  { %2607 = vmatpush.bf16.msra.mxu3 %v4072_v25  ;;  %v1504_v48 = vpop.f32.mrf.mxu3  ;;  %v1463_v25 = vadd.f32 %v1462_v28, %v1449_v42  ;;  %v1421_v47 = vadd.f32 %v5312_v7, %v1407_v62  ;;  %v4107_v7 = vld [vmem:[#allocation8 + $0xe8] sm:$0xf]  ;;  %v4484_v26 = vor.u32 %v4974_v21, %v4483_v19  ;;  %v4467_v28 = vld [vmem:[#allocation8 + $0x3c0] sm:$0xf]  ;;  %v4962_v62 = vld [vmem:[#allocation8 + $0x38c] sm:$0xf0] }
 0x103   :  { %v1517_v11 = vadd.f32 %v1516_v61, %v1503_v10  ;;  %v4468_v33 = vor.u32 %v4970_v32, %v4467_v28  ;;  %v4108_v42 = vor.u32 %v4879_v22, %v4107_v7  ;;  %v4075_v61 = vld [vmem:[#allocation8 + $0xa8] sm:$0xf]  ;;  %v4275_v19 = vld [vmem:[#allocation8 + $0x240] sm:$0xf]  ;;  %v4895_v22 = vld [vmem:[#allocation8 + $0x174] sm:$0xf0] }
 0x104   :  { %v1477_v57 = vadd.f32 %v1476_v53, %v1463_v25  ;;  %v1435_v16 = vadd.f32 %v5298_v37, %v1421_v47  ;;  %v4339_v37 = vld [vmem:[#allocation8 + $0x2c0] sm:$0xf]  ;;  %2591 = vmatpush.bf16.msrb.mxu0 %v4484_v26  ;;  %v4452_v53 = vor.u32 %v4966_v51, %v4451_v50  ;;  %v4220_v25 = vor.u32 %v4907_v41, %v4219_v40  ;;  %v4203_v10 = vld [vmem:[#allocation8 + $0x1a8] sm:$0xf]  ;;  %v4887_v51 = vld [vmem:[#allocation8 + $0x134] sm:$0xf0] }
 0x105   :  { %2622 = vmatpush.bf16.msra.mxu1 %v4184_v2  ;;  %v4403_v21 = vld [vmem:[#allocation8 + $0x340] sm:$0xf]  ;;  %v4171_v7 = vld [vmem:[#allocation8 + $0x168] sm:$0xf] }
 0x106   :  { %2608 = vmatpush.bf16.msra.mxu3 %v4056_v3  ;;  %v1491_v63 = vadd.f32 %v1490_v59, %v1477_v57  ;;  %v4903_v57 = vld [vmem:[#allocation8 + $0x1b4] sm:$0xf0]  ;;  %v4155_v41 = vld [vmem:[#allocation8 + $0x148] sm:$0xf] }
 0x107   :  { %v1518_v6 = vpop.f32.mrf.mxu2  ;;  %v4139_v50 = vld [vmem:[#allocation8 + $0x128] sm:$0xf] }
 0x108   :  { %v1505_v2 = vadd.f32 %v1504_v48, %v1491_v63  ;;  %2592 = vmatpush.bf16.msrb.mxu0 %v4468_v33  ;;  %v4172_v33 = vor.u32 %v4895_v22, %v4171_v7 }
 0x109   :  { %2623 = vmatpush.bf16.msra.mxu1 %v4168_v18  ;;  %v4355_v18 = vld [vmem:[#allocation8 + $0x2e0] sm:$0xf] }
 0x10a   :  { %2609 = vmatpush.bf16.msra.mxu3 %v4040_v15  ;;  %v1530_v1 = vpop.f32.mrf.mxu3  ;;  %v1519_v9 = vadd.f32 %v1518_v6, %v1505_v2  ;;  %v1735_v15 = vmax.f32 %v1435_v16, 0.0  ;;  %v4356_v20 = vor.u32 %v4942_v58, %v4355_v18  ;;  %v4204_v2 = vor.u32 %v4903_v57, %v4203_v10  ;;  %v4926_v6 = vld [vmem:[#allocation8 + $0x26c] sm:$0xf0]  ;;  %v4187_v16 = vld [vmem:[#allocation8 + $0x188] sm:$0xf] }
 0x10b   :  { %v1531_v3 = vadd.f32 %v1530_v1, %v1517_v11  ;;  %v4436_v1 = vor.u32 %v4962_v62, %v4435_v60  ;;  %v4946_v10 = vld [vmem:[#allocation8 + $0x30c] sm:$0xf0]  ;;  %v4972_v60 = vld [vmem:[#allocation8 + $0x3e4] sm:$0xf]  ;;  %v4485_v62 = vld [vmem:[#allocation8 + $0x3f0] sm:$0xf0] }
 0x10c   :  { %2577 = vmatpush.bf16.msrb.mxu2 %v4356_v20  ;;  %2593 = vmatpush.bf16.msrb.mxu0 %v4452_v53  ;;  %v4922_v20 = vld [vmem:[#allocation8 + $0x24c] sm:$0xf0] }
 0x10d   :  { %2624 = vmatpush.bf16.msra.mxu1 %v4152_v4  ;;  %v1732_v5 = vmax.f32 %v1531_v3, 0.0  ;;  %v4340_v4 = vor.u32 %v4938_v29, %v4339_v37  ;;  %v4059_v3 = vld [vmem:[#allocation8 + $0x88] sm:$0xf]  ;;  %v4276_v26 = vor.u32 %v4922_v20, %v4275_v19  ;;  %v4954_v37 = vld [vmem:[#allocation8 + $0x34c] sm:$0xf0] }
 0x10e   :  { %2610 = vmatpush.bf16.msra.mxu3 %v4024_v30  ;;  %v4235_v30 = vld [vmem:[#allocation8 + $0x1e8] sm:$0xf]  ;;  %v4404_v28 = vor.u32 %v4954_v37, %v4403_v21  ;;  %v4469_v20 = vld [vmem:[#allocation8 + $0x3d0] sm:$0xf0]  ;;  %v4873_v37 = vld [vmem:[#allocation8 + $0xcc] sm:$0xf] }
 0x10f   :  { %v1739_v8 = vpack.c.bf16 %v1732_v5, %v1731_v0  ;;  %v5327_v27 = vpop.f32.mrf.mxu0  ;;  %v4867_v0 = vld [vmem:[#allocation8 + $0x94] sm:$0xf0]  ;;  %v4291_v5 = vld [vmem:[#allocation8 + $0x260] sm:$0xf] }
 0x110   :  { %2578 = vmatpush.bf16.msrb.mxu2 %v4340_v4  ;;  %2594 = vmatpush.bf16.msrb.mxu0 %v4436_v1  ;;  %v4060_v18 = vor.u32 %v4867_v0, %v4059_v3  ;;  %v3995_v1 = vld [vmem:[#allocation8 + $0x8] sm:$0xf]  ;;  %v4851_v3 = vld [vmem:[#allocation8 + $0x14] sm:$0xf0] }
 0x111   :  { %2625 = vmatpush.bf16.msra.mxu1 %v4136_v43  ;;  %1743 = vst [vmem:[#allocation3] sm:$0xff] %v1739_v8  ;;  %v4236_v43 = vor.u32 %v4911_v31, %v4235_v30  ;;  %v5337_v63 = vpop.f32.mrf.mxu1  ;;  %v4419_v8 = vld [vmem:[#allocation8 + $0x360] sm:$0xf]  ;;  %v4027_v30 = vld [vmem:[#allocation8 + $0x48] sm:$0xf]  ;;  %v3996_v22 = vor.u32 %v4851_v3, %v3995_v1 }
 0x112   :  { %2611 = vmatpush.bf16.msra.mxu3 %v4008_v44  ;;  %v1532_v12 = vpop.f32.mrf.mxu3  ;;  %v4859_v31 = vld [vmem:[#allocation8 + $0x54] sm:$0xf0]  ;;  %v4123_v0 = vld [vmem:[#allocation8 + $0x108] sm:$0xf] }
 0x113   :  { %v1533_v13 = vadd.f32 %v1532_v12, %v1519_v9  ;;  %v4899_v9 = vld [vmem:[#allocation8 + $0x194] sm:$0xf0]  ;;  %v4292_v12 = vor.u32 %v4926_v6, %v4291_v5  ;;  %v4012_v5 = vor.u32 %v4855_v49, %v4011_v45  ;;  %v4140_v6 = vor.u32 %v4887_v51, %v4139_v50  ;;  %v4077_v45 = vld [vmem:[#allocation8 + $0xb8] sm:$0xf0]  ;;  %v4928_v51 = vld [vmem:[#allocation8 + $0x284] sm:$0xf] }
 0x114   :  { %2579 = vmatpush.bf16.msrb.mxu2 %v4324_v52  ;;  %v4188_v58 = vor.u32 %v4899_v9, %v4187_v16  ;;  %v4028_v52 = vor.u32 %v4859_v31, %v4027_v30  ;;  %v4877_v16 = vld [vmem:[#allocation8 + $0xec] sm:$0xf]  ;;  %v4109_v9 = vld [vmem:[#allocation8 + $0xf8] sm:$0xf0] }
 0x115   :  { %2626 = vmatpush.bf16.msra.mxu1 %v4120_v35  ;;  %v1736_v55 = vmax.f32 %v1533_v13, 0.0  ;;  %v4307_v35 = vld [vmem:[#allocation8 + $0x280] sm:$0xf]  ;;  %v4958_v13 = vld [vmem:[#allocation8 + $0x36c] sm:$0xf0]  ;;  %v4112_v30 = vor.u32 %v4877_v16, %v4109_v9 }
 0x116   :  { %2612 = vmatpush.bf16.msra.mxu3 %v3992_v23  ;;  %v4871_v23 = vld [vmem:[#allocation8 + $0xb4] sm:$0xf0]  ;;  %v4308_v59 = vor.u32 %v4930_v56, %v4307_v35  ;;  %v4940_v35 = vld [vmem:[#allocation8 + $0x2e4] sm:$0xf]  ;;  %v4357_v56 = vld [vmem:[#allocation8 + $0x2f0] sm:$0xf0] }
 0x117   :  { %v1741_v17 = vpack.c.bf16 %v1736_v55, %v1735_v15  ;;  %v5335_v11 = vpop.f32.mrf.mxu0  ;;  %v4076_v47 = vor.u32 %v4871_v23, %v4075_v61  ;;  %v4420_v15 = vor.u32 %v4958_v13, %v4419_v8  ;;  %v4043_v55 = vld [vmem:[#allocation8 + $0x68] sm:$0xf]  ;;  %v4243_v61 = vld [vmem:[#allocation8 + $0x200] sm:$0xf]  ;;  %v4914_v23 = vld [vmem:[#allocation8 + $0x20c] sm:$0xf0] }
 0x118   :  { %v3971_v34 = vld [vmem:[#allocation3] sm:$0xf]  ;;  %v4844_v36 = vld [vmem:[#allocation3 + $0x4] sm:$0xf]  ;;  %2580 = vmatpush.bf16.msrb.mxu2 %v4308_v59  ;;  %v4360_v59 = vor.u32 %v4940_v35, %v4357_v56  ;;  %v4883_v8 = vld [vmem:[#allocation8 + $0x114] sm:$0xf0] }
 0x119   :  { %1745 = vst [vmem:[#allocation3 + $0x10] sm:$0xff] %v1741_v17  ;;  %v4863_v17 = vld [vmem:[#allocation8 + $0x74] sm:$0xf0]  ;;  %2595 = vmatpush.bf16.msrb.mxu0 %v4420_v15  ;;  %v5345_v40 = vpop.f32.mrf.mxu1  ;;  %v4936_v13 = vld [vmem:[#allocation8 + $0x2c4] sm:$0xf] }
 0x11a   :  { %v4044_v32 = vor.u32 %v4863_v17, %v4043_v55  ;;  %v4341_v15 = vld [vmem:[#allocation8 + $0x2d0] sm:$0xf0]  ;;  %v4968_v55 = vld [vmem:[#allocation8 + $0x3c4] sm:$0xf]  ;;  %v4189_v16 = vld [vmem:[#allocation8 + $0x198] sm:$0xf0] }
 0x11b   :  { %v4344_v19 = vor.u32 %v4936_v13, %v4341_v15  ;;  %v4472_v7 = vor.u32 %v4968_v55, %v4469_v20  ;;  %v4437_v35 = vld [vmem:[#allocation8 + $0x390] sm:$0xf0]  ;;  %v315_v15 = vperm.slane %v5303_v46, 3 }
 0x11c   :  { %2581 = vmatpush.bf16.msrb.mxu2 %v4292_v12  ;;  %v4421_v13 = vld [vmem:[#allocation8 + $0x370] sm:$0xf0] }
 0x11d   :  { %2596 = vmatpush.bf16.msrb.mxu0 %v4404_v28  ;;  %v4093_v28 = vld [vmem:[#allocation8 + $0xd8] sm:$0xf0] }
 0x11e   :  { %v5341_v4 = vpop.f32.mrf.mxu3  ;;  %v4096_v49 = vor.u32 %v4873_v37, %v4093_v28  ;;  %v4952_v37 = vld [vmem:[#allocation8 + $0x344] sm:$0xf]  ;;  %v4173_v28 = vld [vmem:[#allocation8 + $0x178] sm:$0xf0] }
 0x11f   :  { %v5339_v29 = vpop.f32.mrf.mxu0  ;;  %v5343_v39 = vpop.f32.mrf.mxu2 }
 0x120   :  { %v4846_v44 = vld [vmem:[#allocation3 + $0xc] sm:$0xf0]  ;;  %v3973_v14 = vld [vmem:[#allocation3 + $0x10] sm:$0xf0]  ;;  %2582 = vmatpush.bf16.msrb.mxu2 %v4276_v26  ;;  %v4124_v26 = vor.u32 %v4883_v8, %v4123_v0  ;;  %v4897_v8 = vld [vmem:[#allocation8 + $0x18c] sm:$0xf] }
 0x121   :  { %v5329_v24 = vor.u32 %v4846_v44, %v3971_v34  ;;  %v5331_v48 = vor.u32 %v4844_v36, %v3973_v14  ;;  %v4259_v34 = vld [vmem:[#allocation8 + $0x220] sm:$0xf]  ;;  %v4918_v36 = vld [vmem:[#allocation8 + $0x22c] sm:$0xf0]  ;;  %v4891_v44 = vld [vmem:[#allocation8 + $0x154] sm:$0xf0] }
 0x122   :  { %v4260_v14 = vor.u32 %v4918_v36, %v4259_v34  ;;  %v4156_v53 = vor.u32 %v4891_v44, %v4155_v41  ;;  %v4964_v34 = vld [vmem:[#allocation8 + $0x3a4] sm:$0xf]  ;;  %v4905_v36 = vld [vmem:[#allocation8 + $0x1cc] sm:$0xf]  ;;  %v4453_v44 = vld [vmem:[#allocation8 + $0x3b0] sm:$0xf0] }
 0x123   :  { %2557 = vmatmul.bf16.vlgmr.msrb.gmra.mxu3 %v5329_v24  ;;  %2571 = vmatmul.bf16.vlgmr.msrb.gmra.mxu1 %v5331_v48 }
 0x124   :  { %2661 = vmatpush.bf16.msrb.mxu3 %v4108_v42  ;;  %2675 = vmatpush.bf16.msrb.mxu1 %v4236_v43  ;;  %v4950_v42 = vld [vmem:[#allocation8 + $0x32c] sm:$0xf0] }
 0x125   :  { %v4388_v43 = vor.u32 %v4950_v42, %v4387_v38  ;;  %2583 = vmatpush.bf16.msrb.mxu2 %v4260_v14  ;;  %v4221_v38 = vld [vmem:[#allocation8 + $0x1d8] sm:$0xf0]  ;;  %v4456_v14 = vor.u32 %v4964_v34, %v4453_v44  ;;  %v314_v42 = vperm.slane %v5303_v46, 2 }
 0x126   :  { %v5353_v17 = vpop.f32.mrf.mxu3  ;;  %v4224_v50 = vor.u32 %v4905_v36, %v4221_v38  ;;  %v4261_v38 = vld [vmem:[#allocation8 + $0x230] sm:$0xf0] }
 0x127   :  { %2597 = vmatpush.bf16.msrb.mxu0 %v4388_v43  ;;  %v5355_v21 = vpop.f32.mrf.mxu2  ;;  %v4869_v43 = vld [vmem:[#allocation8 + $0xac] sm:$0xf]  ;;  %v1545_v1 = vadd.f32 %v5337_v63, %v314_v42 }
 0x128   :  { %2662 = vmatpush.bf16.msrb.mxu3 %v4092_v54  ;;  %2676 = vmatpush.bf16.msrb.mxu1 %v4220_v25  ;;  %v4371_v54 = vld [vmem:[#allocation8 + $0x300] sm:$0xf]  ;;  %v4244_v25 = vor.u32 %v4914_v23, %v4243_v61  ;;  %v4080_v3 = vor.u32 %v4869_v43, %v4077_v45 }
 0x129   :  { %v4372_v57 = vor.u32 %v4946_v10, %v4371_v54  ;;  %v4901_v54 = vld [vmem:[#allocation8 + $0x1ac] sm:$0xf]  ;;  %v1559_v63 = vadd.f32 %v5341_v4, %v1545_v1  ;;  %v4948_v4 = vld [vmem:[#allocation8 + $0x324] sm:$0xf] }
 0x12a   :  { %2584 = vmatpush.bf16.msrb.mxu2 %v4244_v25  ;;  %v4205_v25 = vld [vmem:[#allocation8 + $0x1b8] sm:$0xf0] }
 0x12b   :  { %2598 = vmatpush.bf16.msrb.mxu0 %v4372_v57  ;;  %v4208_v0 = vor.u32 %v4901_v54, %v4205_v25  ;;  %v1573_v43 = vadd.f32 %v5327_v27, %v1559_v63  ;;  %v4889_v54 = vld [vmem:[#allocation8 + $0x14c] sm:$0xf]  ;;  %v4157_v25 = vld [vmem:[#allocation8 + $0x158] sm:$0xf0] }
 0x12c   :  { %2663 = vmatpush.bf16.msrb.mxu3 %v4076_v47  ;;  %2677 = vmatpush.bf16.msrb.mxu1 %v4204_v2  ;;  %v4488_v47 = vor.u32 %v4972_v60, %v4485_v62  ;;  %v5349_v2 = vpop.f32.mrf.mxu0  ;;  %v4865_v60 = vld [vmem:[#allocation8 + $0x8c] sm:$0xf]  ;;  %v4061_v62 = vld [vmem:[#allocation8 + $0x98] sm:$0xf0] }
 0x12d   :  { %v4064_v20 = vor.u32 %v4865_v60, %v4061_v62  ;;  %v4944_v60 = vld [vmem:[#allocation8 + $0x304] sm:$0xf]  ;;  %v4373_v62 = vld [vmem:[#allocation8 + $0x310] sm:$0xf0]  ;;  %v1587_v1 = vadd.f32 %v5343_v39, %v1573_v43  ;;  %v4849_v63 = vld [vmem:[#allocation8 + $0xc] sm:$0xf] }
 0x12e   :  { %2633 = vmatpush.bf16.msra.mxu2 %v4360_v59 }
 0x12f   :  { %2647 = vmatpush.bf16.msra.mxu0 %v4488_v47  ;;  %v4924_v47 = vld [vmem:[#allocation8 + $0x264] sm:$0xf] }
 0x130   :  { %2664 = vmatpush.bf16.msrb.mxu3 %v4060_v18  ;;  %2678 = vmatpush.bf16.msrb.mxu1 %v4188_v58  ;;  %v4909_v18 = vld [vmem:[#allocation8 + $0x1ec] sm:$0xf]  ;;  %v4237_v58 = vld [vmem:[#allocation8 + $0x1f8] sm:$0xf0] }
 0x131   :  { %v5351_v12 = vpop.f32.mrf.mxu1  ;;  %v4240_v31 = vor.u32 %v4909_v18, %v4237_v58  ;;  %v4861_v18 = vld [vmem:[#allocation8 + $0x6c] sm:$0xf]  ;;  %v4045_v58 = vld [vmem:[#allocation8 + $0x78] sm:$0xf0] }
 0x132   :  { %2634 = vmatpush.bf16.msra.mxu2 %v4344_v19  ;;  %v4893_v19 = vld [vmem:[#allocation8 + $0x16c] sm:$0xf] }
 0x133   :  { %2613 = vmatmul.bf16.vlgmr.msra.gmra.mxu3 %v5329_v24  ;;  %2627 = vmatmul.bf16.vlgmr.msra.gmra.mxu1 %v5331_v48 }
 0x134   :  { %2665 = vmatpush.bf16.msrb.mxu3 %v4044_v32  ;;  %2679 = vmatpush.bf16.msrb.mxu1 %v4172_v33  ;;  %v4932_v32 = vld [vmem:[#allocation8 + $0x2a4] sm:$0xf]  ;;  %v4325_v33 = vld [vmem:[#allocation8 + $0x2b0] sm:$0xf0]  ;;  %v5360_v23 = vpop.f32.mrf.mxu0 }
 0x135   :  { %2648 = vmatpush.bf16.msra.mxu0 %v4472_v7  ;;  %v4328_v41 = vor.u32 %v4932_v32, %v4325_v33  ;;  %v4192_v7 = vor.u32 %v4897_v8, %v4189_v16  ;;  %v4916_v32 = vld [vmem:[#allocation8 + $0x224] sm:$0xf]  ;;  %v4376_v16 = vor.u32 %v4944_v60, %v4373_v62 }
 0x137   :  { %2635 = vmatpush.bf16.msra.mxu2 %v4328_v41  ;;  %v4389_v41 = vld [vmem:[#allocation8 + $0x330] sm:$0xf0] }
 0x138   :  { %2666 = vmatpush.bf16.msrb.mxu3 %v4028_v52  ;;  %2680 = vmatpush.bf16.msrb.mxu1 %v4156_v53  ;;  %v4309_v52 = vld [vmem:[#allocation8 + $0x290] sm:$0xf0]  ;;  %v4960_v53 = vld [vmem:[#allocation8 + $0x384] sm:$0xf] }
 0x139   :  { %2649 = vmatpush.bf16.msra.mxu0 %v4456_v14  ;;  %v4312_v10 = vor.u32 %v4928_v51, %v4309_v52  ;;  %v5362_v56 = vpop.f32.mrf.mxu1  ;;  %v4440_v59 = vor.u32 %v4960_v53, %v4437_v35  ;;  %v4857_v51 = vld [vmem:[#allocation8 + $0x4c] sm:$0xf]  ;;  %v4029_v52 = vld [vmem:[#allocation8 + $0x58] sm:$0xf0]  ;;  %v1547_v53 = vadd.f32 %v5345_v40, %v314_v42  ;;  %v4392_v35 = vor.u32 %v4948_v4, %v4389_v41 }
 0x13a   :  { %v4013_v40 = vld [vmem:[#allocation8 + $0x38] sm:$0xf0] }
 0x13b   :  { %2636 = vmatpush.bf16.msra.mxu2 %v4312_v10  ;;  %v4264_v10 = vor.u32 %v4916_v32, %v4261_v38  ;;  %v1561_v42 = vadd.f32 %v5353_v17, %v1547_v53 }
 0x13c   :  { %2667 = vmatpush.bf16.msrb.mxu3 %v4012_v5  ;;  %2681 = vmatpush.bf16.msrb.mxu1 %v4140_v6  ;;  %v4293_v5 = vld [vmem:[#allocation8 + $0x270] sm:$0xf0]  ;;  %v4956_v6 = vld [vmem:[#allocation8 + $0x364] sm:$0xf]  ;;  %v1658_v14 = vpop.f32.mrf.mxu0 }
 0x13d   :  { %2650 = vmatpush.bf16.msra.mxu0 %v4440_v59  ;;  %v4296_v9 = vor.u32 %v4924_v47, %v4293_v5  ;;  %v4424_v55 = vor.u32 %v4956_v6, %v4421_v13  ;;  %v4245_v59 = vld [vmem:[#allocation8 + $0x210] sm:$0xf0]  ;;  %v4853_v47 = vld [vmem:[#allocation8 + $0x2c] sm:$0xf]  ;;  %v4141_v6 = vld [vmem:[#allocation8 + $0x138] sm:$0xf0]  ;;  %v1601_v13 = vadd.f32 %v5351_v12, %v1587_v1 }
 0x13e   :  { %v5358_v61 = vpop.f32.mrf.mxu3  ;;  %v4885_v5 = vld [vmem:[#allocation8 + $0x12c] sm:$0xf]  ;;  %v4016_v39 = vor.u32 %v4853_v47, %v4013_v40  ;;  %v4475_v47 = vld [vmem:[#allocation8 + $0x3c8] sm:$0xf]  ;;  %v4971_v40 = vld [vmem:[#allocation8 + $0x3d4] sm:$0xf0] }
 0x13f   :  { %v1642_v57 = vpop.f32.mrf.mxu2  ;;  %2637 = vmatpush.bf16.msra.mxu2 %v4296_v9  ;;  %v4144_v17 = vor.u32 %v4885_v5, %v4141_v6  ;;  %v4476_v5 = vor.u32 %v4971_v40, %v4475_v47  ;;  %v4331_v6 = vld [vmem:[#allocation8 + $0x2a8] sm:$0xf] }
 0x140   :  { %2668 = vmatpush.bf16.msrb.mxu3 %v3996_v22  ;;  %2682 = vmatpush.bf16.msrb.mxu1 %v4124_v26  ;;  %v4920_v22 = vld [vmem:[#allocation8 + $0x244] sm:$0xf]  ;;  %v4277_v26 = vld [vmem:[#allocation8 + $0x250] sm:$0xf0]  ;;  %v1643_v33 = vadd.f32 %v1642_v57, %v315_v15 }
 0x141   :  { %2651 = vmatpush.bf16.msra.mxu0 %v4424_v55  ;;  %v4912_v57 = vld [vmem:[#allocation8 + $0x204] sm:$0xf] }
 0x142   :  { %v1657_v27 = vadd.f32 %v5360_v23, %v1643_v33  ;;  %v4248_v8 = vor.u32 %v4912_v57, %v4245_v59  ;;  %v4975_v57 = vld [vmem:[#allocation8 + $0x3f4] sm:$0xf0]  ;;  %v4347_v59 = vld [vmem:[#allocation8 + $0x2c8] sm:$0xf] }
 0x143   :  { %2669 = vmatmul.bf16.vlgmr.msrb.gmra.mxu3 %v5329_v24  ;;  %2683 = vmatmul.bf16.vlgmr.msrb.gmra.mxu1 %v5331_v48 }
 0x144   :  { %2717 = vmatpush.bf16.msra.mxu3 %v4112_v30  ;;  %2731 = vmatpush.bf16.msra.mxu1 %v4240_v31  ;;  %v4280_v30 = vor.u32 %v4920_v22, %v4277_v26  ;;  %v4405_v31 = vld [vmem:[#allocation8 + $0x350] sm:$0xf0]  ;;  %v1615_v22 = vadd.f32 %v5358_v61, %v1601_v13 }
 0x145   :  { %v4408_v36 = vor.u32 %v4952_v37, %v4405_v31  ;;  %v4881_v37 = vld [vmem:[#allocation8 + $0x10c] sm:$0xf] }
 0x146   :  { %v5373_v44 = vpop.f32.mrf.mxu3  ;;  %2638 = vmatpush.bf16.msra.mxu2 %v4280_v30  ;;  %v1629_v33 = vadd.f32 %v5339_v29, %v1615_v22  ;;  %v4959_v22 = vld [vmem:[#allocation8 + $0x374] sm:$0xf0] }
 0x147   :  { %v1644_v45 = vpop.f32.mrf.mxu2  ;;  %2652 = vmatpush.bf16.msra.mxu0 %v4408_v36 }
 0x148   :  { %2718 = vmatpush.bf16.msra.mxu3 %v4096_v49  ;;  %2732 = vmatpush.bf16.msra.mxu1 %v4224_v50  ;;  %v4048_v49 = vor.u32 %v4861_v18, %v4045_v58  ;;  %v4176_v50 = vor.u32 %v4893_v19, %v4173_v28  ;;  %v1645_v18 = vadd.f32 %v1644_v45, %v315_v15  ;;  %v4125_v28 = vld [vmem:[#allocation8 + $0x118] sm:$0xf0]  ;;  %v1733_v41 = vmax.f32 %v1629_v33, 0.0  ;;  %v4919_v33 = vld [vmem:[#allocation8 + $0x234] sm:$0xf0] }
 0x149   :  { %v4128_v31 = vor.u32 %v4881_v37, %v4125_v28  ;;  %v4283_v28 = vld [vmem:[#allocation8 + $0x248] sm:$0xf] }
 0x14a   :  { %2639 = vmatpush.bf16.msra.mxu2 %v4264_v10  ;;  %v1659_v46 = vadd.f32 %v1658_v14, %v1645_v18  ;;  %v4943_v10 = vld [vmem:[#allocation8 + $0x2f4] sm:$0xf0]  ;;  %v4443_v18 = vld [vmem:[#allocation8 + $0x388] sm:$0xf] }
 0x14b   :  { %2653 = vmatpush.bf16.msra.mxu0 %v4392_v35  ;;  %v4491_v35 = vld [vmem:[#allocation8 + $0x3e8] sm:$0xf] }
 0x14c   :  { %2719 = vmatpush.bf16.msra.mxu3 %v4080_v3  ;;  %2733 = vmatpush.bf16.msra.mxu1 %v4208_v0  ;;  %v4032_v3 = vor.u32 %v4857_v51, %v4029_v52  ;;  %v4160_v0 = vor.u32 %v4889_v54, %v4157_v25  ;;  %v4492_v1 = vor.u32 %v4975_v57, %v4491_v35  ;;  %v4933_v35 = vld [vmem:[#allocation8 + $0x2ac] sm:$0xf]  ;;  %v4333_v57 = vld [vmem:[#allocation8 + $0x2b8] sm:$0xf0] }
 0x14e   :  { %2640 = vmatpush.bf16.msra.mxu2 %v4248_v8  ;;  %v4935_v8 = vld [vmem:[#allocation8 + $0x2b4] sm:$0xf0] }
 0x14f   :  { %2654 = vmatpush.bf16.msra.mxu0 %v4376_v16  ;;  %v4459_v16 = vld [vmem:[#allocation8 + $0x3a8] sm:$0xf] }
 0x150   :  { %2720 = vmatpush.bf16.msra.mxu3 %v4064_v20  ;;  %2734 = vmatpush.bf16.msra.mxu1 %v4192_v7  ;;  %v3997_v20 = vld [vmem:[#allocation8 + $0x18] sm:$0xf0]  ;;  %v1575_v7 = vadd.f32 %v5335_v11, %v1561_v42 }
 0x151   :  { %v1670_v34 = vpop.f32.mrf.mxu1  ;;  %v4000_v30 = vor.u32 %v4849_v63, %v3997_v20  ;;  %v4299_v63 = vld [vmem:[#allocation8 + $0x268] sm:$0xf]  ;;  %v4927_v20 = vld [vmem:[#allocation8 + $0x274] sm:$0xf0] }
 0x152   :  { %v1671_v23 = vadd.f32 %v1670_v34, %v1657_v27  ;;  %v1589_v32 = vadd.f32 %v5355_v21, %v1575_v7  ;;  %v4427_v7 = vld [vmem:[#allocation8 + $0x368] sm:$0xf] }
 0x153   :  { %v1712_v26 = vpop.f32.mrf.mxu0  ;;  %v4428_v37 = vor.u32 %v4959_v22, %v4427_v7 }
 0x154   :  { %2721 = vmatpush.bf16.msra.mxu3 %v4048_v49  ;;  %2735 = vmatpush.bf16.msra.mxu1 %v4176_v50  ;;  %v1603_v61 = vadd.f32 %v5362_v56, %v1589_v32  ;;  %v4267_v32 = vld [vmem:[#allocation8 + $0x228] sm:$0xf] }
 0x156   :  { %v1617_v14 = vadd.f32 %v5373_v44, %v1603_v61  ;;  %v4363_v44 = vld [vmem:[#allocation8 + $0x2e8] sm:$0xf]  ;;  %v4268_v61 = vor.u32 %v4919_v33, %v4267_v32  ;;  %v4986_v32 = vld [vmem:[#allocation10 + $0x30] sm:$0xff] }
 0x157   :  { %v4994_v33 = vld [vmem:[#allocation10 + $0x70] sm:$0xff] }
 0x158   :  { %2722 = vmatpush.bf16.msra.mxu3 %v4032_v3  ;;  %2736 = vmatpush.bf16.msra.mxu1 %v4160_v0  ;;  %v1631_v21 = vadd.f32 %v5349_v2, %v1617_v14  ;;  %v4939_v0 = vld [vmem:[#allocation8 + $0x2d4] sm:$0xf0] }
 0x159   :  { %v1672_v9 = vpop.f32.mrf.mxu1  ;;  %v4348_v42 = vor.u32 %v4939_v0, %v4347_v59  ;;  %v4947_v14 = vld [vmem:[#allocation8 + $0x314] sm:$0xf0]  ;;  %v4461_v59 = vld [vmem:[#allocation8 + $0x3b8] sm:$0xf0] }
 0x15a   :  { %v1673_v34 = vadd.f32 %v1672_v9, %v1659_v46  ;;  %v1737_v53 = vmax.f32 %v1631_v21, 0.0  ;;  %v4332_v9 = vor.u32 %v4935_v8, %v4331_v6  ;;  %v4955_v46 = vld [vmem:[#allocation8 + $0x354] sm:$0xf0]  ;;  %v4445_v0 = vld [vmem:[#allocation8 + $0x398] sm:$0xf0] }
 0x15b   :  { %v1714_v50 = vpop.f32.mrf.mxu0  ;;  %v4957_v6 = vld [vmem:[#allocation8 + $0x36c] sm:$0xf]  ;;  %v4429_v8 = vld [vmem:[#allocation8 + $0x378] sm:$0xf0] }
 0x15c   :  { %2723 = vmatpush.bf16.msra.mxu3 %v4016_v39  ;;  %2737 = vmatpush.bf16.msra.mxu1 %v4144_v17  ;;  %v4931_v39 = vld [vmem:[#allocation8 + $0x294] sm:$0xf0] }
 0x15e   :  { %v1684_v55 = vpop.f32.mrf.mxu3 }
 0x15f   :  { %v1685_v58 = vadd.f32 %v1684_v55, %v1671_v23  ;;  %v1698_v19 = vpop.f32.mrf.mxu2  ;;  %v4967_v23 = vld [vmem:[#allocation8 + $0x3b4] sm:$0xf0]  ;;  %v4315_v55 = vld [vmem:[#allocation8 + $0x288] sm:$0xf] }
 0x160   :  { %2724 = vmatpush.bf16.msra.mxu3 %v4000_v30  ;;  %2738 = vmatpush.bf16.msra.mxu1 %v4128_v31  ;;  %v4460_v13 = vor.u32 %v4967_v23, %v4459_v16  ;;  %v4411_v30 = vld [vmem:[#allocation8 + $0x348] sm:$0xf]  ;;  %v4432_v23 = vor.u32 %v4957_v6, %v4429_v8 }
 0x161   :  { %v1699_v12 = vadd.f32 %v1698_v19, %v1685_v58  ;;  %v1726_v11 = vpop.f32.mrf.mxu1  ;;  %v4963_v58 = vld [vmem:[#allocation8 + $0x394] sm:$0xf0]  ;;  %v4316_v19 = vor.u32 %v4931_v39, %v4315_v55  ;;  %v4412_v31 = vor.u32 %v4955_v46, %v4411_v30  ;;  %v4953_v55 = vld [vmem:[#allocation8 + $0x34c] sm:$0xf]  ;;  %v4413_v39 = vld [vmem:[#allocation8 + $0x358] sm:$0xf0] }
 0x162   :  { %v4444_v17 = vor.u32 %v4963_v58, %v4443_v18  ;;  %v4416_v58 = vor.u32 %v4953_v55, %v4413_v39  ;;  %v5003_v39 = vld [vmem:[#allocation10 + $0xb8] sm:$0xff] }
 0x163   :  { %v1713_v15 = vadd.f32 %v1712_v26, %v1699_v12  ;;  %2725 = vmatmul.bf16.vlgmr.msra.gmra.mxu3 %v5329_v24  ;;  %2739 = vmatmul.bf16.vlgmr.msra.gmra.mxu1 %v5331_v48  ;;  %v4364_v48 = vor.u32 %v4943_v10, %v4363_v44  ;;  %v4300_v26 = vor.u32 %v4927_v20, %v4299_v63  ;;  %v4923_v12 = vld [vmem:[#allocation8 + $0x254] sm:$0xf0]  ;;  %v4949_v63 = vld [vmem:[#allocation8 + $0x32c] sm:$0xf]  ;;  %v4397_v20 = vld [vmem:[#allocation8 + $0x338] sm:$0xf0] }
 0x164   :  { %v4400_v22 = vor.u32 %v4949_v63, %v4397_v20 }
 0x165   :  { %v1727_v36 = vadd.f32 %v1726_v11, %v1713_v15  ;;  %v4284_v15 = vor.u32 %v4923_v12, %v4283_v28  ;;  %v4951_v11 = vld [vmem:[#allocation8 + $0x334] sm:$0xf0]  ;;  %v4945_v28 = vld [vmem:[#allocation8 + $0x30c] sm:$0xf]  ;;  %v4381_v12 = vld [vmem:[#allocation8 + $0x318] sm:$0xf0] }
 0x166   :  { %v1686_v38 = vpop.f32.mrf.mxu3  ;;  %v4384_v46 = vor.u32 %v4945_v28, %v4381_v12  ;;  %v5001_v12 = vld [vmem:[#allocation10 + $0xa8] sm:$0xff] }
 0x167   :  { %v1687_v4 = vadd.f32 %v1686_v38, %v1673_v34  ;;  %v1734_v43 = vmax.f32 %v1727_v36, 0.0  ;;  %v1700_v45 = vpop.f32.mrf.mxu2  ;;  %v4395_v34 = vld [vmem:[#allocation8 + $0x328] sm:$0xf] }
 0x168   :  { %v4396_v36 = vor.u32 %v4951_v11, %v4395_v34  ;;  %v4251_v38 = vld [vmem:[#allocation8 + $0x208] sm:$0xf] }
 0x169   :  { %v1701_v49 = vadd.f32 %v1700_v45, %v1687_v4  ;;  %v1740_v51 = vpack.c.bf16 %v1734_v43, %v1733_v41  ;;  %v1728_v56 = vpop.f32.mrf.mxu1  ;;  %v4915_v4 = vld [vmem:[#allocation8 + $0x214] sm:$0xf0]  ;;  %v4379_v41 = vld [vmem:[#allocation8 + $0x308] sm:$0xf]  ;;  %v4941_v43 = vld [vmem:[#allocation8 + $0x2ec] sm:$0xf] }
 0x16a   :  { %v4365_v45 = vld [vmem:[#allocation8 + $0x2f8] sm:$0xf0]  ;;  %v4985_v11 = vld [vmem:[#allocation10 + $0x28] sm:$0xff] }
 0x16b   :  { %v1715_v29 = vadd.f32 %v1714_v50, %v1701_v49  ;;  %1744 = vst [vmem:[#allocation3 + $0x8] sm:$0xff] %v1740_v51  ;;  %v4973_v49 = vld [vmem:[#allocation8 + $0x3ec] sm:$0xf]  ;;  %v4493_v50 = vld [vmem:[#allocation8 + $0x3f8] sm:$0xf0]  ;;  %v4252_v51 = vor.u32 %v4915_v4, %v4251_v38  ;;  %v4368_v21 = vor.u32 %v4941_v43, %v4365_v45  ;;  %v4992_v38 = vld [vmem:[#allocation10 + $0x60] sm:$0xff] }
 0x16c   :  { %v4982_v43 = vld [vmem:[#allocation10 + $0x10] sm:$0xff] }
 0x16d   :  { %v1729_v52 = vadd.f32 %v1728_v56, %v1715_v29  ;;  %v4380_v29 = vor.u32 %v4947_v14, %v4379_v41  ;;  %v4496_v56 = vor.u32 %v4973_v49, %v4493_v50  ;;  %v4991_v41 = vld [vmem:[#allocation10 + $0x58] sm:$0xff]  ;;  %v4990_v45 = vld [vmem:[#allocation10 + $0x50] sm:$0xff]  ;;  %v5409_v49 = vld [vmem:[%s5428_s4] sm:$0xf] }
 0x16f   :  { %v1738_v54 = vmax.f32 %v1729_v52, 0.0  ;;  %v4937_v52 = vld [vmem:[#allocation8 + $0x2cc] sm:$0xf] }
 0x171   :  { %v1742_v25 = vpack.c.bf16 %v1738_v54, %v1737_v53  ;;  %v4349_v53 = vld [vmem:[#allocation8 + $0x2d8] sm:$0xf0]  ;;  %v4969_v54 = vld [vmem:[#allocation8 + $0x3cc] sm:$0xf] }
 0x172   :  { %v3979_v27 = vld [vmem:[#allocation3 + $0x8] sm:$0xf]  ;;  %v4845_v24 = vld [vmem:[#allocation3 + $0xc] sm:$0xf]  ;;  %v4352_v44 = vor.u32 %v4937_v52, %v4349_v53 }
 0x173   :  { %1746 = vst [vmem:[#allocation3 + $0x18] sm:$0xff] %v1742_v25  ;;  %v4477_v25 = vld [vmem:[#allocation8 + $0x3d8] sm:$0xf0] }
 0x174   :  { %v4480_v10 = vor.u32 %v4969_v54, %v4477_v25  ;;  %v1882_v25 = vperm.slane %v5409_v49, 1 }
 0x17a   :  { %v4847_v60 = vld [vmem:[#allocation3 + $0x14] sm:$0xf0]  ;;  %v3981_v62 = vld [vmem:[#allocation3 + $0x18] sm:$0xf0] }
 0x17b   :  { %v5394_v3 = vor.u32 %v4847_v60, %v3979_v27  ;;  %v5396_v2 = vor.u32 %v4845_v24, %v3981_v62  ;;  %v4965_v27 = vld [vmem:[#allocation8 + $0x3ac] sm:$0xf]  ;;  %v4336_v60 = vor.u32 %v4933_v35, %v4333_v57 }
 0x17c   :  { %v4464_v24 = vor.u32 %v4965_v27, %v4461_v59  ;;  %v4929_v62 = vld [vmem:[#allocation8 + $0x28c] sm:$0xf] }
 0x17d   :  { %2585 = vmatmul.bf16.vlgmr.msrb.gmra.mxu2 %v5394_v3  ;;  %2599 = vmatmul.bf16.vlgmr.msrb.gmra.mxu0 %v5396_v2 }
 0x17e   :  { %2689 = vmatpush.bf16.msrb.mxu2 %v4364_v48  ;;  %2703 = vmatpush.bf16.msrb.mxu0 %v4492_v1  ;;  %v4317_v48 = vld [vmem:[#allocation8 + $0x298] sm:$0xf0]  ;;  %v4961_v1 = vld [vmem:[#allocation8 + $0x38c] sm:$0xf] }
 0x17f   :  { %v4320_v47 = vor.u32 %v4929_v62, %v4317_v48  ;;  %v4448_v40 = vor.u32 %v4961_v1, %v4445_v0 }
 0x182   :  { %2690 = vmatpush.bf16.msrb.mxu2 %v4348_v42  ;;  %2704 = vmatpush.bf16.msrb.mxu0 %v4476_v5  ;;  %v4925_v42 = vld [vmem:[#allocation8 + $0x26c] sm:$0xf]  ;;  %v4301_v5 = vld [vmem:[#allocation8 + $0x278] sm:$0xf0] }
 0x183   :  { %v4304_v16 = vor.u32 %v4925_v42, %v4301_v5 }
 0x186   :  { %2691 = vmatpush.bf16.msrb.mxu2 %v4332_v9  ;;  %2705 = vmatpush.bf16.msrb.mxu0 %v4460_v13  ;;  %v4921_v9 = vld [vmem:[#allocation8 + $0x24c] sm:$0xf]  ;;  %v4285_v13 = vld [vmem:[#allocation8 + $0x258] sm:$0xf0] }
 0x187   :  { %v4288_v18 = vor.u32 %v4921_v9, %v4285_v13 }
 0x18a   :  { %2692 = vmatpush.bf16.msrb.mxu2 %v4316_v19  ;;  %2706 = vmatpush.bf16.msrb.mxu0 %v4444_v17  ;;  %v4917_v19 = vld [vmem:[#allocation8 + $0x22c] sm:$0xf]  ;;  %v4269_v17 = vld [vmem:[#allocation8 + $0x238] sm:$0xf0] }
 0x18b   :  { %v4272_v7 = vor.u32 %v4917_v19, %v4269_v17 }
 0x18d   :  { %2641 = vmatmul.bf16.vlgmr.msra.gmra.mxu2 %v5394_v3  ;;  %2655 = vmatmul.bf16.vlgmr.msra.gmra.mxu0 %v5396_v2 }
 0x18e   :  { %2693 = vmatpush.bf16.msrb.mxu2 %v4300_v26  ;;  %2707 = vmatpush.bf16.msrb.mxu0 %v4428_v37  ;;  %v4913_v26 = vld [vmem:[#allocation8 + $0x20c] sm:$0xf]  ;;  %v4253_v37 = vld [vmem:[#allocation8 + $0x218] sm:$0xf0] }
 0x18f   :  { %v4256_v30 = vor.u32 %v4913_v26, %v4253_v37 }
 0x192   :  { %2694 = vmatpush.bf16.msrb.mxu2 %v4284_v15  ;;  %2708 = vmatpush.bf16.msrb.mxu0 %v4412_v31  ;;  %v4987_v15 = vld [vmem:[#allocation10 + $0x38] sm:$0xff] }
 0x193   :  { %v4995_v31 = vld [vmem:[#allocation10 + $0x78] sm:$0xff]  ;;  %3073 = vmatpush.bf16.msrb.mxu3 %v4987_v15  ;;  %v5000_v15 = vld [vmem:[#allocation10 + $0xa0] sm:$0xff] }
 0x194   :  { %3087 = vmatpush.bf16.msrb.mxu1 %v4995_v31  ;;  %v5008_v31 = vld [vmem:[#allocation10 + $0xe0] sm:$0xff] }
 0x196   :  { %2695 = vmatpush.bf16.msrb.mxu2 %v4268_v61  ;;  %2709 = vmatpush.bf16.msrb.mxu0 %v4396_v36  ;;  %v4993_v61 = vld [vmem:[#allocation10 + $0x68] sm:$0xff]  ;;  %v4984_v36 = vld [vmem:[#allocation10 + $0x20] sm:$0xff] }
 0x197   :  { %3074 = vmatpush.bf16.msrb.mxu3 %v4986_v32 }
 0x198   :  { %3088 = vmatpush.bf16.msrb.mxu1 %v4994_v33 }
 0x19a   :  { %2696 = vmatpush.bf16.msrb.mxu2 %v4252_v51  ;;  %2710 = vmatpush.bf16.msrb.mxu0 %v4380_v29  ;;  %v1881_v29 = vperm.slane %v5409_v49, 0 }
 0x19b   :  { %3075 = vmatpush.bf16.msrb.mxu3 %v4985_v11  ;;  %v5007_v11 = vld [vmem:[#allocation10 + $0xd8] sm:$0xff] }
 0x19c   :  { %3089 = vmatpush.bf16.msrb.mxu1 %v4993_v61 }
 0x19d   :  { %2697 = vmatmul.bf16.vlgmr.msrb.gmra.mxu2 %v5394_v3  ;;  %2711 = vmatmul.bf16.vlgmr.msrb.gmra.mxu0 %v5396_v2 }
 0x19e   :  { %2745 = vmatpush.bf16.msra.mxu2 %v4368_v21  ;;  %2759 = vmatpush.bf16.msra.mxu0 %v4496_v56  ;;  %v4981_v21 = vld [vmem:[#allocation10 + $0x8] sm:$0xff] }
 0x19f   :  { %3076 = vmatpush.bf16.msrb.mxu3 %v4984_v36  ;;  %v4989_v56 = vld [vmem:[#allocation10 + $0x48] sm:$0xff] }
 0x1a0   :  { %v2572_v4 = vpop.f32.mrf.mxu1  ;;  %3090 = vmatpush.bf16.msrb.mxu1 %v4992_v38 }
 0x1a2   :  { %2746 = vmatpush.bf16.msra.mxu2 %v4352_v44  ;;  %2760 = vmatpush.bf16.msra.mxu0 %v4480_v10  ;;  %v4980_v44 = vld [vmem:[#allocation10] sm:$0xff] }
 0x1a3   :  { %v4988_v10 = vld [vmem:[#allocation10 + $0x40] sm:$0xff] }
 0x1a4   :  { %3091 = vmatpush.bf16.msrb.mxu1 %v4991_v41 }
 0x1a6   :  { %2747 = vmatpush.bf16.msra.mxu2 %v4336_v60  ;;  %2761 = vmatpush.bf16.msra.mxu0 %v4464_v24  ;;  %v2558_v34 = vpop.f32.mrf.mxu3 }
 0x1a7   :  { %v2559_v54 = vadd.f32 %v2558_v34, %v1881_v29  ;;  %v4999_v34 = vld [vmem:[#allocation10 + $0x98] sm:$0xff] }
 0x1a8   :  { %3092 = vmatpush.bf16.msrb.mxu1 %v4990_v45  ;;  %v2574_v51 = vpop.f32.mrf.mxu1  ;;  %v5006_v45 = vld [vmem:[#allocation10 + $0xd0] sm:$0xff] }
 0x1a9   :  { %v2573_v27 = vadd.f32 %v2572_v4, %v2559_v54 }
 0x1aa   :  { %2748 = vmatpush.bf16.msra.mxu2 %v4320_v47  ;;  %2762 = vmatpush.bf16.msra.mxu0 %v4448_v40 }
 0x1ac   :  { %3093 = vmatpush.bf16.msrb.mxu1 %v4989_v56  ;;  %v4996_v56 = vld [vmem:[#allocation10 + $0x80] sm:$0xff] }
 0x1ae   :  { %2749 = vmatpush.bf16.msra.mxu2 %v4304_v16  ;;  %2763 = vmatpush.bf16.msra.mxu0 %v4432_v23 }
 0x1b0   :  { %3094 = vmatpush.bf16.msrb.mxu1 %v4988_v10  ;;  %v2628_v59 = vpop.f32.mrf.mxu1 }
 0x1b2   :  { %2750 = vmatpush.bf16.msra.mxu2 %v4288_v18  ;;  %2764 = vmatpush.bf16.msra.mxu0 %v4416_v58  ;;  %v5011_v18 = vld [vmem:[#allocation10 + $0xf8] sm:$0xff] }
 0x1b6   :  { %2751 = vmatpush.bf16.msra.mxu2 %v4272_v7  ;;  %2765 = vmatpush.bf16.msra.mxu0 %v4400_v22  ;;  %v5002_v7 = vld [vmem:[#allocation10 + $0xb0] sm:$0xff] }
 0x1b7   :  { %v5010_v22 = vld [vmem:[#allocation10 + $0xf0] sm:$0xff] }
 0x1b8   :  { %v2630_v9 = vpop.f32.mrf.mxu1 }
 0x1ba   :  { %2752 = vmatpush.bf16.msra.mxu2 %v4256_v30  ;;  %2766 = vmatpush.bf16.msra.mxu0 %v4384_v46  ;;  %v5009_v30 = vld [vmem:[#allocation10 + $0xe8] sm:$0xff] }
 0x1bd   :  { %2753 = vmatmul.bf16.vlgmr.msra.gmra.mxu2 %v5394_v3  ;;  %2767 = vmatmul.bf16.vlgmr.msra.gmra.mxu0 %v5396_v2  ;;  %v2560_v3 = vpop.f32.mrf.mxu3  ;;  %v4983_v2 = vld [vmem:[#allocation10 + $0x18] sm:$0xff] }
 0x1be   :  { %3077 = vmatpush.bf16.msrb.mxu3 %v4983_v2  ;;  %v2561_v24 = vadd.f32 %v2560_v3, %v1881_v29  ;;  %3101 = vmatpush.bf16.msrb.mxu2 %v5003_v39  ;;  %v1883_v29 = vperm.slane %v5409_v49, 2 }
 0x1bf   :  { %3115 = vmatpush.bf16.msrb.mxu0 %v5011_v18 }
 0x1c0   :  { %v2575_v5 = vadd.f32 %v2574_v51, %v2561_v24  ;;  %v2684_v32 = vpop.f32.mrf.mxu1  ;;  %v5005_v51 = vld [vmem:[#allocation10 + $0xc8] sm:$0xff] }
 0x1c2   :  { %3078 = vmatpush.bf16.msrb.mxu3 %v4982_v43  ;;  %3102 = vmatpush.bf16.msrb.mxu2 %v5002_v7  ;;  %v4998_v43 = vld [vmem:[#allocation10 + $0x90] sm:$0xff] }
 0x1c3   :  { %3116 = vmatpush.bf16.msrb.mxu0 %v5010_v22 }
 0x1c5   :  { %v2614_v52 = vpop.f32.mrf.mxu3 }
 0x1c6   :  { %3079 = vmatpush.bf16.msrb.mxu3 %v4981_v21  ;;  %v2615_v57 = vadd.f32 %v2614_v52, %v1882_v25  ;;  %3103 = vmatpush.bf16.msrb.mxu2 %v5001_v12  ;;  %v5004_v52 = vld [vmem:[#allocation10 + $0xc0] sm:$0xff] }
 0x1c7   :  { %3117 = vmatpush.bf16.msrb.mxu0 %v5009_v30 }
 0x1c8   :  { %v2629_v48 = vadd.f32 %v2628_v59, %v2615_v57  ;;  %v2686_v21 = vpop.f32.mrf.mxu1 }
 0x1ca   :  { %3080 = vmatpush.bf16.msrb.mxu3 %v4980_v44  ;;  %3104 = vmatpush.bf16.msrb.mxu2 %v5000_v15 }
 0x1cb   :  { %3118 = vmatpush.bf16.msrb.mxu0 %v5008_v31 }
 0x1cd   :  { %v2616_v62 = vpop.f32.mrf.mxu3 }
 0x1ce   :  { %v2617_v42 = vadd.f32 %v2616_v62, %v1882_v25  ;;  %3105 = vmatpush.bf16.msrb.mxu2 %v4999_v34  ;;  %v1884_v25 = vperm.slane %v5409_v49, 3 }
 0x1cf   :  { %3119 = vmatpush.bf16.msrb.mxu0 %v5007_v11 }
 0x1d0   :  { %v2631_v55 = vadd.f32 %v2630_v9, %v2617_v42 }
 0x1d2   :  { %3106 = vmatpush.bf16.msrb.mxu2 %v4998_v43 }
 0x1d3   :  { %3120 = vmatpush.bf16.msrb.mxu0 %v5006_v45 }
 0x1d5   :  { %v2670_v46 = vpop.f32.mrf.mxu3 }
 0x1d6   :  { %v2671_v54 = vadd.f32 %v2670_v46, %v1883_v29  ;;  %v5025_v46 = vld [vmem:[%s5430_s6] ss:$0 sm:$0xff] }
 0x1d7   :  { %3121 = vmatpush.bf16.msrb.mxu0 %v5005_v51 }
 0x1d8   :  { %v2685_v57 = vadd.f32 %v2684_v32, %v2671_v54 }
 0x1db   :  { %3122 = vmatpush.bf16.msrb.mxu0 %v5004_v52 }
 0x1dd   :  { %v2672_v2 = vpop.f32.mrf.mxu3 }
 0x1fa   :  { %v2600_v14 = vpop.f32.mrf.mxu0 }
 0x200   :  { %v2586_v50 = vpop.f32.mrf.mxu2 }
 0x201   :  { %v2587_v60 = vadd.f32 %v2586_v50, %v2573_v27  ;;  %v4997_v50 = vld [vmem:[#allocation10 + $0x88] sm:$0xff]  ;;  %v2740_v27 = vpop.f32.mrf.mxu1 }
 0x202   :  { %v2602_v53 = vpop.f32.mrf.mxu0  ;;  %3107 = vmatpush.bf16.msrb.mxu2 %v4997_v50 }
 0x203   :  { %v2601_v47 = vadd.f32 %v2600_v14, %v2587_v60  ;;  %v2673_v60 = vadd.f32 %v2672_v2, %v1883_v29 }
 0x205   :  { %v2773_v8 = vmax.f32 %v2601_v47, 0.0  ;;  %v2687_v42 = vadd.f32 %v2686_v21, %v2673_v60 }
 0x206   :  { %3108 = vmatpush.bf16.msrb.mxu2 %v4996_v56 }
 0x208   :  { %v2588_v35 = vpop.f32.mrf.mxu2 }
 0x209   :  { %v2589_v16 = vadd.f32 %v2588_v35, %v2575_v5 }
 0x20a   :  { %v2656_v1 = vpop.f32.mrf.mxu0 }
 0x20b   :  { %v2603_v19 = vadd.f32 %v2602_v53, %v2589_v16  ;;  %v2726_v53 = vpop.f32.mrf.mxu3  ;;  %v2742_v16 = vpop.f32.mrf.mxu1 }
 0x20c   :  { %v2727_v35 = vadd.f32 %v2726_v53, %v1884_v25 }
 0x20d   :  { %v2777_v26 = vmax.f32 %v2603_v19, 0.0 }
 0x20e   :  { %v2741_v62 = vadd.f32 %v2740_v27, %v2727_v35 }
 0x210   :  { %v2642_v0 = vpop.f32.mrf.mxu2 }
 0x211   :  { %v2643_v40 = vadd.f32 %v2642_v0, %v2629_v48 }
 0x212   :  { %v2658_v63 = vpop.f32.mrf.mxu0 }
 0x213   :  { %v2657_v6 = vadd.f32 %v2656_v1, %v2643_v40  ;;  %v2728_v24 = vpop.f32.mrf.mxu3 }
 0x214   :  { %v2729_v40 = vadd.f32 %v2728_v24, %v1884_v25 }
 0x215   :  { %v2774_v23 = vmax.f32 %v2657_v6, 0.0 }
 0x216   :  { %v2743_v9 = vadd.f32 %v2742_v16, %v2729_v40 }
 0x217   :  { %v2781_v13 = vpack.c.bf16 %v2774_v23, %v2773_v8 }
 0x218   :  { %v2644_v58 = vpop.f32.mrf.mxu2 }
 0x219   :  { %2785 = vst [vmem:[#allocation4] sm:$0xff] %v2781_v13  ;;  %v2645_v17 = vadd.f32 %v2644_v58, %v2631_v55 }
 0x21a   :  { %v2712_v41 = vpop.f32.mrf.mxu0 }
 0x21b   :  { %v2659_v20 = vadd.f32 %v2658_v63, %v2645_v17 }
 0x21d   :  { %v2778_v37 = vmax.f32 %v2659_v20, 0.0 }
 0x21f   :  { %v2783_v28 = vpack.c.bf16 %v2778_v37, %v2777_v26 }
 0x220   :  { %v4499_v33 = vld [vmem:[#allocation4] sm:$0xf]  ;;  %v4976_v36 = vld [vmem:[#allocation4 + $0x4] sm:$0xf]  ;;  %v2698_v14 = vpop.f32.mrf.mxu2 }
 0x221   :  { %2787 = vst [vmem:[#allocation4 + $0x10] sm:$0xff] %v2783_v28  ;;  %v2699_v59 = vadd.f32 %v2698_v14, %v2685_v57 }
 0x222   :  { %v2714_v44 = vpop.f32.mrf.mxu0 }
 0x223   :  { %v2713_v0 = vadd.f32 %v2712_v41, %v2699_v59 }
 0x225   :  { %v2775_v6 = vmax.f32 %v2713_v0, 0.0 }
 0x228   :  { %v4978_v61 = vld [vmem:[#allocation4 + $0xc] sm:$0xf0]  ;;  %v4501_v38 = vld [vmem:[#allocation4 + $0x10] sm:$0xf0]  ;;  %v2700_v10 = vpop.f32.mrf.mxu2 }
 0x229   :  { %v4500_v4 = vor.u32 %v4978_v61, %v4499_v33  ;;  %v4504_v3 = vor.u32 %v4976_v36, %v4501_v38  ;;  %v2701_v49 = vadd.f32 %v2700_v10, %v2687_v42 }
 0x22b   :  { %3081 = vmatmul.bf16.vlgmr.msrb.gmra.mxu3 %v4500_v4  ;;  %3095 = vmatmul.bf16.vlgmr.msrb.gmra.mxu1 %v4504_v3  ;;  %v2715_v55 = vadd.f32 %v2714_v44, %v2701_v49 }
 0x22d   :  { %v2779_v19 = vmax.f32 %v2715_v55, 0.0 }
 0x23a   :  { %v2768_v48 = vpop.f32.mrf.mxu0 }
 0x240   :  { %v2754_v1 = vpop.f32.mrf.mxu2 }
 0x241   :  { %v2755_v47 = vadd.f32 %v2754_v1, %v2741_v62 }
 0x242   :  { %v2770_v18 = vpop.f32.mrf.mxu0 }
 0x243   :  { %v2769_v5 = vadd.f32 %v2768_v48, %v2755_v47 }
 0x245   :  { %v2776_v8 = vmax.f32 %v2769_v5, 0.0 }
 0x247   :  { %v2782_v23 = vpack.c.bf16 %v2776_v8, %v2775_v6 }
 0x248   :  { %v2756_v13 = vpop.f32.mrf.mxu2 }
 0x249   :  { %2786 = vst [vmem:[#allocation4 + $0x8] sm:$0xff] %v2782_v23  ;;  %v2757_v39 = vadd.f32 %v2756_v13, %v2743_v9 }
 0x24b   :  { %v2771_v58 = vadd.f32 %v2770_v18, %v2757_v39 }
 0x24d   :  { %v2780_v17 = vmax.f32 %v2771_v58, 0.0 }
 0x24f   :  { %v2784_v63 = vpack.c.bf16 %v2780_v17, %v2779_v19 }
 0x250   :  { %v4507_v20 = vld [vmem:[#allocation4 + $0x8] sm:$0xf]  ;;  %v4977_v22 = vld [vmem:[#allocation4 + $0xc] sm:$0xf] }
 0x251   :  { %2788 = vst [vmem:[#allocation4 + $0x18] sm:$0xff] %v2784_v63 }
 0x258   :  { %v4979_v7 = vld [vmem:[#allocation4 + $0x14] sm:$0xf0]  ;;  %v4509_v26 = vld [vmem:[#allocation4 + $0x18] sm:$0xf0] }
 0x259   :  { %v4508_v37 = vor.u32 %v4979_v7, %v4507_v20  ;;  %v4512_v28 = vor.u32 %v4977_v22, %v4509_v26 }
 0x25b   :  { %3109 = vmatmul.bf16.vlgmr.msrb.gmra.mxu2 %v4508_v37  ;;  %3123 = vmatmul.bf16.vlgmr.msrb.gmra.mxu0 %v4512_v28 }
 0x2a8   :  { %v3096_v30 = vpop.f32.mrf.mxu1 }
 0x2ae   :  { %v3082_v12 = vpop.f32.mrf.mxu3 }
 0x2af   :  { %v3083_v33 = vadd.f32 %v5025_v46, %v3082_v12 }
 0x2b0   :  { %v3098_v61 = vpop.f32.mrf.mxu1 }
 0x2b1   :  { %v3097_v11 = vadd.f32 %v3096_v30, %v3083_v33 }
 0x2b6   :  { %v3084_v15 = vpop.f32.mrf.mxu3 }
 0x2b7   :  { %v3085_v34 = vadd.f32 %v5025_v46, %v3084_v15 }
 0x2b9   :  { %v3099_v38 = vadd.f32 %v3098_v61, %v3085_v34 }
 0x2d8   :  { %v3124_v31 = vpop.f32.mrf.mxu0 }
 0x2de   :  { %v3110_v32 = vpop.f32.mrf.mxu2 }
 0x2df   :  { %v3111_v36 = vadd.f32 %v3110_v32, %v3097_v11 }
 0x2e0   :  { %v3126_v2 = vpop.f32.mrf.mxu0 }
 0x2e1   :  { %v3125_v41 = vadd.f32 %v3124_v31, %v3111_v36 }
 0x2e6   :  { %v3112_v4 = vpop.f32.mrf.mxu2 }
 0x2e7   :  { %v3113_v3 = vadd.f32 %v3112_v4, %v3099_v38 }
 0x2e9   :  { %v3127_v14 = vadd.f32 %v3126_v2, %v3113_v3 }
 0x2eb   :  { %v5015_v43 = vpack.c.bf16 %v3127_v14, %v3125_v41 }
 0x2ed   :  { %5016 = vst [vmem:[#allocation11] sm:$0xff] %v5015_v43  }
 0x2ee   :  { %3145 = dma.vmem_to_hbm [thread:$0]  %s3138_s25, 128, %s3140_s28, [#allocation7], %s5133_s17, %s5133_s17, %s5134_s18  }
 0x2ef   :  { %5126 = dma.done.wait [#allocation7], 128  }
 0x2f0   :  { %5127 = vsyncadd [#allocation7], 4294967168 }
 0x2f1   :  { %3150 = vsyncpa [#allocation6], 1 }
 0x2f2   :  { %3151 = vsyncpa [#allocation9], 1 }
 0x2f3   :  { %3152 = vsyncpa [#allocation7], 1 }

</bundles_post_ra>
